<compile_context>
chip_gen: v6e
topology: v6e:2x2x1
jax: 0.10.0
libtpu: 0.0.40
codegen_flags: <defaults>
</compile_context>

<pallas_src>
import functools

import jax
import jax.numpy as jnp
import numpy as np
from jax.experimental import pallas as pl
from jax.experimental.pallas import tpu as pltpu

_VMEM_LIMIT_BYTES = 32 * 1024 * 1024   # safe on v5e/v6e/v7x (v7x physical = 64 MiB)
_VMEM_TILE_BUDGET = 20 * 1024 * 1024   # per-step working set target (with headroom)


def _im2col_conv(xp, w_ref, TH, W, Cin):
    """xp: (TH+2, W+2, Cin) bf16 row tile + halo.  Returns (TH*W, Cout) f32."""
    # Assemble the 9 shifted windows in bf16 (keeps vreg/VMEM pressure low) and
    # contract once on the MXU with K = 9*Cin.
    taps = [xp[kh:kh + TH, kw:kw + W, :] for kh in range(3) for kw in range(3)]
    patches = jnp.concatenate(taps, axis=-1).reshape(TH * W, 9 * Cin)   # bf16
    return jnp.dot(patches, w_ref[...], preferred_element_type=jnp.float32)


def _conv_stats_kernel(xt_ref, w_ref, stat_ref, *, TH, W, Cin, Cout):
    # xt_ref  : (1, 1, TH+2, W+2, Cin) bf16   row tile + halo
    # w_ref   : (9*Cin, Cout)          bf16   im2col weight slab
    # stat_ref: (1, 1, 2, Cout)        f32    packed [sum; sumsq] partials
    xp = xt_ref[0, 0]
    acc = _im2col_conv(xp, w_ref, TH, W, Cin)              # (TH*W, Cout) f32
    s = jnp.sum(acc, axis=0, keepdims=True)                # (1, Cout)
    sq = jnp.sum(acc * acc, axis=0, keepdims=True)         # (1, Cout)
    stat_ref[...] = jnp.concatenate([s, sq], axis=0).reshape(stat_ref.shape)


def _conv_bn_relu_pool_kernel(xt_ref, w_ref, scale_ref, shift_ref, o_ref,
                              *, TH, W, Cin, Cout):
    # xt_ref   : (1, 1, TH+2, W+2, Cin) bf16
    # w_ref    : (9*Cin, Cout)          bf16
    # scale_ref/shift_ref : (1, Cout)   f32   folded BatchNorm affine
    # o_ref    : (1, Cout, PW) (or (1, 1, Cout, PW)) f32, PW = (TH//2)*(W//2)
    xp = xt_ref[0, 0]
    acc = _im2col_conv(xp, w_ref, TH, W, Cin)              # (TH*W, Cout) f32
    z = jnp.maximum(acc * scale_ref[...] + shift_ref[...], 0.0)   # BN + ReLU
    # 2x2/2 max pool in the matmul's natural (pixels, channels) layout: pairwise
    # maxima over size-2 non-lane axes, channels stay on the lane axis throughout.
    zw = jnp.max(z.reshape(TH, W // 2, 2, Cout), axis=2)          # pool along W
    zp = jnp.max(zw.reshape(TH // 2, 2, W // 2, Cout), axis=1)    # pool along H
    zp = zp.reshape((TH // 2) * (W // 2), Cout)
    # Single small transpose for the channels-first, lane-dense final-layout store.
    o_ref[...] = zp.T.reshape(o_ref.shape)


def _tile_vmem_bytes(th, W, Cin, Cout):
    halo = (th + 2) * (W + 2) * Cin * 2         # bf16 input tile
    pooled = (th // 2) * (W // 2) * Cout * 4    # f32 pooled output tile
    patches = th * W * 9 * Cin * 2              # bf16 im2col scratch
    acc = th * W * Cout * 4                     # f32 conv accumulator
    return 2 * (halo + pooled) + patches + acc  # streamed blocks double-buffered


def _pick_row_tile(H, W, Cin, Cout):
    even_divs = [d for d in range(H, 0, -1) if H % d == 0 and d % 2 == 0]
    for require_lane_aligned in (True, False):
        for d in even_divs:                      # largest first
            pw = (d // 2) * (W // 2)
            if _tile_vmem_bytes(d, W, Cin, Cout) > _VMEM_TILE_BUDGET:
                continue
            if require_lane_aligned and not (d == H or pw % 128 == 0):
                continue
            return d
    return even_divs[-1]


def cnn_forward(x_nchw, w_oihw, b, gamma, beta, eps=1e-5):
    # `b` (conv bias) is accepted for API parity but intentionally unused: under
    # training-mode BatchNorm the bias cancels exactly, so the output is identical.
    del b
    N, Cin, H, W = x_nchw.shape
    Cout = w_oihw.shape[0]
    assert H % 2 == 0 and W % 2 == 0

    TH = _pick_row_tile(H, W, Cin, Cout)         # conv output rows per grid step
    HT = H // TH
    PW = (TH // 2) * (W // 2)                    # pooled pixels per tile

    # ---- plain-JAX glue: NCHW -> NHWC bf16, +1 halo, row tiles, weight slab ----
    x = jnp.transpose(x_nchw, (0, 2, 3, 1)).astype(jnp.bfloat16)
    xpad = jnp.pad(x, ((0, 0), (1, 1), (1, 1), (0, 0)))
    if HT == 1:
        x_tiles = xpad[:, None]                                   # (N, 1, H+2, W+2, Cin)
    else:
        # Overlapping row tiles with their halo; ~(TH+2)/TH duplication, but each
        # grid step then DMAs only its own small block (v7x VMEM friendly).
        x_tiles = jnp.stack([xpad[:, t * TH:t * TH + TH + 2] for t in range(HT)],
                            axis=1)                               # (N, HT, TH+2, W+2, Cin)
    wslab = (jnp.transpose(w_oihw, (2, 3, 1, 0))                  # (kh, kw, Cin, Cout)
             .reshape(9 * Cin, Cout).astype(jnp.bfloat16))
    # TODO(synk): for Cout >= 256 (v6e) / 128 (v5e), add a Cout grid axis with
    # blocked weight slabs to keep each dot inside one native MXU tile.

    cparams = pltpu.CompilerParams(
        dimension_semantics=("parallel", "parallel"),
        vmem_limit_bytes=_VMEM_LIMIT_BYTES)
    in_x_spec = pl.BlockSpec((1, 1, TH + 2, W + 2, Cin), lambda n, t: (n, t, 0, 0, 0))
    in_w_spec = pl.BlockSpec((9 * Cin, Cout), lambda n, t: (0, 0))

    # ---- pass 1: conv + packed per-tile f32 channel partial sums (no y in HBM) ----
    stats = pl.pallas_call(
        functools.partial(_conv_stats_kernel, TH=TH, W=W, Cin=Cin, Cout=Cout),
        out_shape=jax.ShapeDtypeStruct((N, HT, 2, Cout), jnp.float32),
        grid=(N, HT),
        in_specs=[in_x_spec, in_w_spec],
        out_specs=pl.BlockSpec((1, 1, 2, Cout), lambda n, t: (n, t, 0, 0)),
        compiler_params=cparams,
    )(x_tiles, wslab)

    # BatchNorm2d (training mode): biased batch statistics over (N, H, W).
    # E[x^2]-E[x]^2 can lose precision for large-mean activations; without the conv
    # bias the conv output is near zero-mean, and the clamp guards the sqrt.
    # TODO(synk): running_mean/running_var buffer updates (stateful PyTorch side
    # effects that don't affect the returned tensor) are not reproduced.
    cnt = float(N * H * W)
    mean = jnp.sum(stats[:, :, 0, :], axis=(0, 1)) / cnt
    var = jnp.maximum(jnp.sum(stats[:, :, 1, :], axis=(0, 1)) / cnt - mean * mean, 0.0)
    scale = gamma.astype(jnp.float32) / jnp.sqrt(var + eps)
    shift = beta.astype(jnp.float32) - mean * scale

    # ---- pass 2: recompute conv, fused BN + ReLU + 2x2 max-pool, final layout ----
    if HT == 1 or PW % 128 == 0:
        # Lane-packed final layout: (N, Cout, (H//2)*(W//2)) -> free reshape to NCHW.
        out_shape = jax.ShapeDtypeStruct((N, Cout, HT * PW), jnp.float32)
        out_spec = pl.BlockSpec((1, Cout, PW), lambda n, t: (n, 0, t))

        def finalize(p):
            return p.reshape(N, Cout, H // 2, W // 2)
    else:
        # Fallback when PW isn't lane-aligned: keep per-tile blocks, transpose in XLA.
        out_shape = jax.ShapeDtypeStruct((N, HT, Cout, PW), jnp.float32)
        out_spec = pl.BlockSpec((1, 1, Cout, PW), lambda n, t: (n, t, 0, 0))

        def finalize(p):
            p = p.reshape(N, HT, Cout, TH // 2, W // 2)
            return jnp.transpose(p, (0, 2, 1, 3, 4)).reshape(N, Cout, H // 2, W // 2)

    pooled = pl.pallas_call(
        functools.partial(_conv_bn_relu_pool_kernel, TH=TH, W=W, Cin=Cin, Cout=Cout),
        out_shape=out_shape,
        grid=(N, HT),
        in_specs=[
            in_x_spec,
            in_w_spec,
            pl.BlockSpec((1, Cout), lambda n, t: (0, 0)),
            pl.BlockSpec((1, Cout), lambda n, t: (0, 0)),
        ],
        out_specs=out_spec,
        compiler_params=cparams,
    )(x_tiles, wslab, scale.reshape(1, Cout), shift.reshape(1, Cout))

    return finalize(pooled)


def reference(x, w, b, gamma, beta, eps=1e-5):
    # Pure-JAX f32 reference (NCHW, matches the PyTorch forward in training mode).
    y = jax.lax.conv_general_dilated(
        x, w, window_strides=(1, 1), padding=((1, 1), (1, 1)),
        dimension_numbers=("NCHW", "OIHW", "NCHW"))
    y = y + b[None, :, None, None]
    mean = jnp.mean(y, axis=(0, 2, 3), keepdims=True)
    var = jnp.mean((y - mean) ** 2, axis=(0, 2, 3), keepdims=True)
    y = (y - mean) / jnp.sqrt(var + eps)
    y = y * gamma[None, :, None, None] + beta[None, :, None, None]
    y = jnp.maximum(y, 0.0)
    N, C, H, W = y.shape
    return y.reshape(N, C, H // 2, 2, W // 2, 2).max(axis=(3, 5))


if __name__ == "__main__":
    N, Cin, Cout, H, W = 2, 4, 8, 16, 16
    key = jax.random.PRNGKey(0)
    kx, kw, kb = jax.random.split(key, 3)

    x = jax.random.normal(kx, (N, Cin, H, W), jnp.float32)
    fan_in = Cin * 3 * 3
    bound = 1.0 / np.sqrt(fan_in)
    conv_w = jax.random.uniform(kw, (Cout, Cin, 3, 3), jnp.float32, -bound, bound)
    conv_b = jax.random.uniform(kb, (Cout,), jnp.float32, -bound, bound)
    bn_gamma = jnp.ones((Cout,), jnp.float32)
    bn_beta = jnp.zeros((Cout,), jnp.float32)

    out = jax.block_until_ready(cnn_forward(x, conv_w, conv_b, bn_gamma, bn_beta))
    ref = jax.block_until_ready(reference(x, conv_w, conv_b, bn_gamma, bn_beta))

    assert out.shape == (N, Cout, H // 2, W // 2)
    # bf16 MXU operands -> slightly looser tolerance vs the f32 reference.
    np.testing.assert_allclose(np.asarray(out), np.asarray(ref), rtol=2e-2, atol=3e-2)
    print("KERNEL_OK")
</pallas_src>

<mosaic_0001>
module attributes {stable_mosaic.version = 11 : i64} {
  func.func @_conv_stats_kernel(%arg0: i32, %arg1: i32, %arg2: memref<1x1x18x18x4xbf16, #tpu.memory_space<vmem>>, %arg3: memref<36x8xbf16, #tpu.memory_space<vmem>>, %arg4: memref<1x1x2x8xf32, #tpu.memory_space<vmem>>) attributes {dimension_semantics = [#tpu.dimension_semantics<parallel>, #tpu.dimension_semantics<parallel>], iteration_bounds = array<i64: 2, 1>, scalar_prefetch = 0 : i64, scratch_operands = 0 : i64, tpu.core_type = #tpu.core_type<tc>, window_params = [{transform_indices = @transform_0, window_bounds = array<i64: 1, 1, 18, 18, 4>}, {pipeline_mode = #tpu.pipeline_mode<synchronous>, transform_indices = @transform_1, window_bounds = array<i64: 36, 8>}, {transform_indices = @transform_2, window_bounds = array<i64: 1, 1, 2, 8>}]} {
    %c0 = arith.constant 0 : index
    %c0_0 = arith.constant 0 : index
    %c0_1 = arith.constant 0 : index
    %c0_2 = arith.constant 0 : index
    %c0_3 = arith.constant 0 : index
    %0 = vector.load %arg2[%c0, %c0_0, %c0_1, %c0_2, %c0_3] : memref<1x1x18x18x4xbf16, #tpu.memory_space<vmem>>, vector<1x1x18x18x4xbf16>
    %1 = vector.shape_cast %0 : vector<1x1x18x18x4xbf16> to vector<18x18x4xbf16>
    %2 = vector.extract_strided_slice %1 {offsets = [0, 0, 0], sizes = [16, 16, 4], strides = [1, 1, 1]} : vector<18x18x4xbf16> to vector<16x16x4xbf16>
    %3 = vector.extract_strided_slice %1 {offsets = [0, 1, 0], sizes = [16, 16, 4], strides = [1, 1, 1]} : vector<18x18x4xbf16> to vector<16x16x4xbf16>
    %4 = vector.extract_strided_slice %1 {offsets = [0, 2, 0], sizes = [16, 16, 4], strides = [1, 1, 1]} : vector<18x18x4xbf16> to vector<16x16x4xbf16>
    %5 = vector.extract_strided_slice %1 {offsets = [1, 0, 0], sizes = [16, 16, 4], strides = [1, 1, 1]} : vector<18x18x4xbf16> to vector<16x16x4xbf16>
    %6 = vector.extract_strided_slice %1 {offsets = [1, 1, 0], sizes = [16, 16, 4], strides = [1, 1, 1]} : vector<18x18x4xbf16> to vector<16x16x4xbf16>
    %7 = vector.extract_strided_slice %1 {offsets = [1, 2, 0], sizes = [16, 16, 4], strides = [1, 1, 1]} : vector<18x18x4xbf16> to vector<16x16x4xbf16>
    %8 = vector.extract_strided_slice %1 {offsets = [2, 0, 0], sizes = [16, 16, 4], strides = [1, 1, 1]} : vector<18x18x4xbf16> to vector<16x16x4xbf16>
    %9 = vector.extract_strided_slice %1 {offsets = [2, 1, 0], sizes = [16, 16, 4], strides = [1, 1, 1]} : vector<18x18x4xbf16> to vector<16x16x4xbf16>
    %10 = vector.extract_strided_slice %1 {offsets = [2, 2, 0], sizes = [16, 16, 4], strides = [1, 1, 1]} : vector<18x18x4xbf16> to vector<16x16x4xbf16>
    %11 = tpu.concatenate %2, %3, %4, %5, %6, %7, %8, %9, %10 in 2 : vector<16x16x4xbf16>, vector<16x16x4xbf16>, vector<16x16x4xbf16>, vector<16x16x4xbf16>, vector<16x16x4xbf16>, vector<16x16x4xbf16>, vector<16x16x4xbf16>, vector<16x16x4xbf16>, vector<16x16x4xbf16> -> vector<16x16x36xbf16>
    %12 = vector.shape_cast %11 : vector<16x16x36xbf16> to vector<256x36xbf16>
    %c0_4 = arith.constant 0 : index
    %c0_5 = arith.constant 0 : index
    %13 = vector.load %arg3[%c0_4, %c0_5] : memref<36x8xbf16, #tpu.memory_space<vmem>>, vector<36x8xbf16>
    %cst = arith.constant dense<0.000000e+00> : vector<256x8xf32>
    %14 = tpu.matmul %12, %13, %cst {dimension_numbers = #tpu.dot_dimension_numbers<[1], [0], [0], [1], [0, 0, 1, 1], [], []>} : vector<256x36xbf16>, vector<36x8xbf16>, vector<256x8xf32> -> vector<256x8xf32>
    %cst_6 = arith.constant dense<0.000000e+00> : vector<8xf32>
    %15 = vector.multi_reduction <add>, %14, %cst_6 [0] : vector<256x8xf32> to vector<8xf32>
    %16 = vector.shape_cast %15 : vector<8xf32> to vector<1x8xf32>
    %17 = arith.mulf %14, %14 : vector<256x8xf32>
    %cst_7 = arith.constant dense<0.000000e+00> : vector<8xf32>
    %18 = vector.multi_reduction <add>, %17, %cst_7 [0] : vector<256x8xf32> to vector<8xf32>
    %19 = vector.shape_cast %18 : vector<8xf32> to vector<1x8xf32>
    %20 = tpu.concatenate %16, %19 in 0 : vector<1x8xf32>, vector<1x8xf32> -> vector<2x8xf32>
    %21 = vector.shape_cast %20 : vector<2x8xf32> to vector<1x1x2x8xf32>
    %c0_8 = arith.constant 0 : index
    %c0_9 = arith.constant 0 : index
    %c0_10 = arith.constant 0 : index
    %c0_11 = arith.constant 0 : index
    %22 = vector.load %arg4[%c0_8, %c0_9, %c0_10, %c0_11] : memref<1x1x2x8xf32, #tpu.memory_space<vmem>>, vector<1x1x2x8xf32>
    tpu.vector_store %arg4[%c0_8, %c0_9, %c0_10, %c0_11], %21 {strides = array<i32>} : memref<1x1x2x8xf32, #tpu.memory_space<vmem>>, vector<1x1x2x8xf32>,
    return
  }
  func.func @transform_0(%arg0: i32, %arg1: i32) -> (i32, i32, i32, i32, i32) {
    %c0_i32 = arith.constant 0 : i32
    %c0_i32_0 = arith.constant 0 : i32
    %c0_i32_1 = arith.constant 0 : i32
    %c0_i32_2 = arith.constant 0 : i32
    return %arg0, %arg1, %c0_i32, %c0_i32_0, %c0_i32_1 : i32, i32, i32, i32, i32
  }
  func.func @transform_1(%arg0: i32, %arg1: i32) -> (i32, i32) {
    %c0_i32 = arith.constant 0 : i32
    %c0_i32_0 = arith.constant 0 : i32
    %c0_i32_1 = arith.constant 0 : i32
    return %c0_i32, %c0_i32_0 : i32, i32
  }
  func.func @transform_2(%arg0: i32, %arg1: i32) -> (i32, i32, i32, i32) {
    %c0_i32 = arith.constant 0 : i32
    %c0_i32_0 = arith.constant 0 : i32
    %c0_i32_1 = arith.constant 0 : i32
    return %arg0, %arg1, %c0_i32, %c0_i32_0 : i32, i32, i32, i32
  }
}

</mosaic_0001>

<bundles_post_ra>
// kernel: tpu_custom_call.1
= control target key start
LH: loop header
LB: loop body
LE: loop exit
PB: predicated region body
PF: predicated region fallthrough
CT: control target
= control target key end

     0   :  { %7 = vsyncpa [#allocation3], 0  ;;  %s2637_s0 = inlined_call_operand.vmem [shape: bf16[2,1,18,18,4], index: 0, kind: input, shape index: {}]   ;;  %s2638_s1 = inlined_call_operand.vmem [shape: bf16[36,8], index: 1, kind: input, shape index: {}]   ;;  %s2639_s2 = inlined_call_operand.hbm [shape: f32[2,1,2,8], index: 2, kind: output, shape index: {}]  }
   0x1   :  { %9 = vsyncpa [#allocation3 + $0x1], 0  ;;  %s1981_s9 = smov 0   ;;  %s1983_s10 = smov 0  }
   0x2   :  { %s1985_s11 = smov 0   ;;  %s1987_s12 = smov 0  }
   0x3   :  { %s1989_s13 = smov 0   ;;  %s1991_s14 = smov 0  }
   0x4 LB: > { %s1645_s15 = sadd.s32 4294967295, %s1955_s14   ;;  %s1646_s16 = sadd.s32 4294967294, %s1955_s14   ;;  %s1955_s14 = sphi %s1991_s14, %s15_s14   ;;  %s1951_s13 = sphi %s1989_s13, %s2646_s13   ;;  %s1947_s12 = sphi %s1987_s12, %s2645_s12   ;;  %s1943_s11 = sphi %s1985_s11, %s2644_s11   ;;  %s1939_s10 = sphi %s1983_s10, %s2643_s10   ;;  %s1935_s9 = sphi %s1981_s9, %s2642_s9  }
   0x5   : > { %s27_s17 = sadd.s32 1, %s1951_s13  ;;  %s85_s18 = sadd.s32 1, %s1943_s11 }
   0x6   : > { %p29_p0 = scmp.ge.s32.totalorder %s27_s17, 2  ;;  %p95_p1 = scmp.ne.s32.totalorder %s1943_s11, %s1939_s10 }
   0x7   : > { %p96_p2 = scmp.eq.s32.totalorder %s1645_s15, 1  ;;  %p101_p3 = scmp.ne.s32.totalorder %s1939_s10, %s1935_s9 }
   0x8   : > { %s2648_s17 = smov (%p29_p0, %s27_s17), 0  ;;  %p102_p5 = scmp.eq.s32.totalorder %s1646_s16, 1 }
   0x9   : > { %p2021_p4 = por %p96_p2, %p95_p1  ;;  %s80_s20 = ssub.s32 %s1951_s13, %s2648_s17 }
   0xa   : > { %p1649_p6 = scmp.ge.s32.totalorder %s1955_s14, 1  ;;  %p83_p7 = scmp.eq.s32.totalorder %s80_s20, 0 }
   0xb   : > { %p2028_p8 = por %p102_p5, %p101_p3  ;;  %p135_p9 = scmp.lt.s32.totalorder %s1955_s14, 3 }
   0xc   : > { %s2034_s22 = scalar_select %p83_p7, %s1943_s11, %s85_s18  }
   0xd   : > { %p136_p10 = pnand %p1649_p6, %p135_p9 }
   0xe   : > { %p161_p11 = scmp.lt.s32.totalorder (!%p136_p10), %s1947_s12, 1  ;;  %s1957_s28 = smov (!%p136_p10), 12  }
   0xf   : > { %139 = sbr.rel (%p136_p10) target bundleno = 629 (0x275), region = 28  ;;  %s1958_s29 = smov (!%p136_p10), 20  }
  0x10   : > { %s1959_s30 = smov (!%p136_p10), 8   ;;  %s1960_s3 = smov (!%p136_p10), 4  }
  0x11   : > { %s1961_s4 = smov (!%p136_p10), 16   ;;  %s1962_s5 = smov (!%p136_p10), 24  }
  0x12   : > { %s1963_s6 = smov (!%p136_p10), 28   ;;  %s1964_s18 = smov (!%p136_p10), 32  }
  0x13   : > { %s1708_s26 = sshll.u32 (!%p136_p10), %s1947_s12, 5 }
  0x14   : > { %s162_s23 = scalar_select %p161_p11, %s1947_s12, 1  ;;  %vm578_vm0 = vcmask 1046528   ;;  %vm353_vm1 = vsmask.f32 7424  ;;  %v1862_v49 = vld [vmem:[%s2638_s1 + $0x8] sm:$0xff]   ;;  %vm1214_vm2 = vcmask 1041408  }
  0x15   : > { %v1860_v45 = vld [vmem:[%s2638_s1 + $0x10] ss:$0 sps:$4 sm:$0x33]   ;;  %v1864_v54 = vld [vmem:[%s2638_s1] sm:$0xff]   ;;  %vm897_vm3 = vcmask 31744   ;;  %vm930_vm4 = vcmask 64512  }
  0x16   : > { %s1776_s24 = smul.u32 216, %s162_s23  ;;  %1774 = vmatprep.subr.msk.bf16.mxu0 %vm1214_vm2, %v1860_v45  ;;  %v1216_v50 = vsel %vm1214_vm2, %v1860_v45, 0  ;;  %1775 = vmatprep.subr.msk.bf16.mxu1 %vm1214_vm2, %v1860_v45  ;;  %vm963_vm5 = vcmask 97280   ;;  %vm996_vm6 = vcmask 130048   ;;  %vm1029_vm7 = vcmask 162816   ;;  %s1965_s12 = smov [#allocation2]  }
  0x17   : > { %1731 = vmatpush3.bf16.msra.mxu0 %v1216_v50  ;;  %1771 = vmatpush3.bf16.msra.mxu1 %v1216_v50  ;;  %vm1062_vm8 = vcmask 195584   ;;  %vm1095_vm9 = vcmask 228352   ;;  %vm1128_vm10 = vcmask 261120   ;;  %vm1181_vm11 = vcmask 293888  }
  0x18   : > { %s2041_s27 = scalar_lea.vmem %s2637_s0, %s1776_s24  ;;  %1732 = vmatprep.subr.bf16.mxu0 %v1862_v49  ;;  %1769 = vmatprep.subr.bf16.mxu1 %v1862_v49  ;;  %s158_s24 = sand.u32 1, %s1939_s10   ;;  %vm1549_vm12 = vcmask 1040384   ;;  %vm1551_vm13 = vcmask 58368  }
  0x19   : > { %v2044_v0 = vld [vmem:[%s2041_s27 + $0x18] sm:$0xff]   ;;  %v2047_v1 = vld [vmem:[%s2041_s27 + $0xc] sm:$0xff]   ;;  %v1842_v2 = vld [vmem:[%s2041_s27 + $0x14] ss:$0 sps:$4 sm:$0x11]   ;;  %s1650_s25 = sshll.u32 %s158_s24, 1 }
  0x1a   : > { %666 = vrot.lane.b32.xlu1 %v2044_v0, %s1957_s28  ;;  %v2053_v3 = vld [vmem:[%s2041_s27] sm:$0xff]   ;;  %664 = vrot.lane.b32.xlu0 %v2047_v1, %s1957_s28  ;;  %v582_v4 = vrot.slane %v2047_v1, 1  ;;  %v583_v5 = vrot.slane %v1842_v2, 1  ;;  %v1844_v6 = vld [vmem:[%s2041_s27 + $0x8] ss:$0 sps:$4 sm:$0x11]  }
  0x1b   : > { %v579_v7 = vrot.slane %v2053_v3, 1  ;;  %v355_v8 = vshrl.u32 %v2053_v3, 16  ;;  %v357_v9 = vshll.u32 %v2053_v3, 16  ;;  %v367_v10 = vshrl.u32 %v2047_v1, 16  ;;  %v2073_v30 = vld [vmem:[%s2041_s27 + $0x24] sm:$0xff]   ;;  %v2100_v48 = vld [vmem:[%s2041_s27 + $0x30] sm:$0xff]   ;;  %1733 = vmatpush3.bf16.msra.mxu0 %v1862_v49  ;;  %1772 = vmatpush3.bf16.msra.mxu1 %v1862_v49 }
  0x1c   : > { %v584_v11 = vsel %vm578_vm0, %v582_v4, %v583_v5  ;;  %v580_v12 = vrot.slane %v1844_v6, 1  ;;  %v362_v13 = vshll.u32 %v1844_v6, 16  ;;  %v1845_v14 = vld [vmem:[%s2041_s27 + $0x20] ss:$0 sps:$4 sm:$0x11]   ;;  %v369_v15 = vshll.u32 %v2047_v1, 16  ;;  %1734 = vmatprep.subr.bf16.mxu0 %v1864_v54  ;;  %1770 = vmatprep.subr.bf16.mxu1 %v1864_v54 }
  0x1d   : > { %v359_v16 = vrot.slane %v357_v9, 1  ;;  %v374_v17 = vshll.u32 %v1842_v2, 16  ;;  %v381_v18 = vshll.u32 %v2044_v0, 16  ;;  %v585_v23 = vrot.slane %v2044_v0, 1  ;;  %v2119_v60 = vld [vmem:[%s2041_s27 + $0x3c] sm:$0xff]   ;;  %v2195_v49 = vld [vmem:[%s2041_s27 + $0x6c] sm:$0xff]  }
  0x1e   : > { %746 = vrot.lane.b32.xlu0 %v584_v11, %s1958_s29  ;;  %v581_v19 = vsel %vm578_vm0, %v579_v7, %v580_v12  ;;  %v364_v20 = vrot.slane %v362_v13, 1  ;;  %v371_v21 = vrot.slane %v369_v15, 1  ;;  %v379_v25 = vshrl.u32 %v2044_v0, 16  ;;  %v1847_v33 = vld [vmem:[%s2041_s27 + $0x2c] ss:$0 sps:$4 sm:$0x11]  }
  0x1f   : > { %627 = vrot.lane.b32.xlu1 %v581_v19, %s1959_s30  ;;  %v360_v22 = vor.u32 %v359_v16, %v355_v8  ;;  %v376_v24 = vrot.slane %v374_v17, 1  ;;  %v586_v26 = vrot.slane %v1845_v14, 1  ;;  %v383_v28 = vrot.slane %v381_v18, 1  ;;  %v1849_v52 = vld [vmem:[%s2041_s27 + $0x38] ss:$0 sps:$4 sm:$0x11]   ;;  %1735 = vmatpush3.bf16.msra.mxu0 %v1864_v54 }
  0x20   : > { %v372_v27 = vor.u32 %v371_v21, %v367_v10  ;;  %v386_v29 = vshll.u32 %v1845_v14, 16  ;;  %v393_v37 = vshll.u32 %v2073_v30, 16  ;;  %v391_v39 = vshrl.u32 %v2073_v30, 16  ;;  %1773 = vmatpush3.bf16.msra.mxu1 %v1864_v54  ;;  %v1851_v2 = vld [vmem:[%s2041_s27 + $0x44] ss:$0 sps:$4 sm:$0x11]  }
  0x21   : > { %v365_v31 = vsel %vm353_vm1, %v360_v22, %v364_v20  ;;  %v587_v34 = vsel %vm578_vm0, %v585_v23, %v586_v26  ;;  %v384_v35 = vor.u32 %v383_v28, %v379_v25  ;;  %v398_v41 = vshll.u32 %v1847_v33, 16  ;;  %v2144_v14 = vld [vmem:[%s2041_s27 + $0x48] sm:$0xff]   ;;  %v1853_v16 = vld [vmem:[%s2041_s27 + $0x50] ss:$0 sps:$4 sm:$0x11]   ;;  %v2157_v23 = vld [vmem:[%s2041_s27 + $0x54] sm:$0xff]  }
  0x22   : > { %546 = vrot.lane.b32.xlu0 %v365_v31, %s1960_s3  ;;  %v377_v32 = vsel %vm353_vm1, %v372_v27, %v376_v24  ;;  %v388_v36 = vrot.slane %v386_v29, 1  ;;  %v395_v40 = vrot.slane %v393_v37, 1  ;;  %v588_v46 = vrot.slane %v2073_v30, 1  ;;  %v1855_v27 = vld [vmem:[%s2041_s27 + $0x5c] ss:$0 sps:$4 sm:$0x11]  }
  0x23   : > { %629 = vrot.lane.b32.xlu1 %v584_v11, %s1959_s30  ;;  %v400_v43 = vrot.slane %v398_v41, 1  ;;  %v589_v47 = vrot.slane %v1847_v33, 1  ;;  %v405_v53 = vshll.u32 %v2100_v48, 16  ;;  %v403_v55 = vshrl.u32 %v2100_v48, 16 }
  0x24   : > { %v389_v38 = vsel %vm353_vm1, %v384_v35, %v388_v36  ;;  %v396_v42 = vor.u32 %v395_v40, %v391_v39  ;;  %v410_v57 = vshll.u32 %v1849_v52, 16  ;;  %v591_v62 = vrot.slane %v2100_v48, 1  ;;  %v2182_v39 = vld [vmem:[%s2041_s27 + $0x60] sm:$0xff]   ;;  %v1857_v41 = vld [vmem:[%s2041_s27 + $0x68] ss:$0 sps:$4 sm:$0x11]  }
  0x25   : > { %v590_v51 = vsel %vm578_vm0, %v588_v46, %v589_v47  ;;  %v407_v56 = vrot.slane %v405_v53, 1  ;;  %v592_v63 = vrot.slane %v1849_v52, 1  ;;  %v417_v4 = vshll.u32 %v2119_v60, 16  ;;  %v1859_v53 = vld [vmem:[%s2041_s27 + $0x74] ss:$0 sps:$4 sm:$0x11]  }
  0x26   : > { %548 = vrot.lane.b32.xlu0 %v377_v32, %s1960_s3  ;;  %v401_v44 = vsel %vm353_vm1, %v396_v42, %v400_v43  ;;  %v412_v59 = vrot.slane %v410_v57, 1  ;;  %v415_v6 = vshrl.u32 %v2119_v60, 16  ;;  %v422_v8 = vshll.u32 %v1851_v2, 16 }
  0x27   : > { %748 = vrot.lane.b32.xlu1 %v587_v34, %s1958_s29  ;;  %v408_v58 = vor.u32 %v407_v56, %v403_v55  ;;  %v593_v5 = vsel %vm578_vm0, %v591_v62, %v592_v63  ;;  %v419_v7 = vrot.slane %v417_v4, 1  ;;  %v594_v12 = vrot.slane %v2119_v60, 1 }
  0x28   : > { %v424_v10 = vrot.slane %v422_v8, 1  ;;  %v595_v13 = vrot.slane %v1851_v2, 1  ;;  %v429_v17 = vshll.u32 %v2144_v14, 16  ;;  %v427_v18 = vshrl.u32 %v2144_v14, 16 }
  0x29   : > { %v413_v61 = vsel %vm353_vm1, %v408_v58, %v412_v59  ;;  %v420_v9 = vor.u32 %v419_v7, %v415_v6  ;;  %v434_v20 = vshll.u32 %v1853_v16, 16  ;;  %v597_v25 = vrot.slane %v2144_v14, 1 }
  0x2a   : > { %711 = vrot.lane.b32.xlu0 %v377_v32, %s1961_s4  ;;  %v596_v15 = vsel %vm578_vm0, %v594_v12, %v595_v13  ;;  %v431_v19 = vrot.slane %v429_v17, 1  ;;  %v598_v26 = vrot.slane %v1853_v16, 1  ;;  %v441_v28 = vshll.u32 %v2157_v23, 16  ;;  %v1863_v13 = vld [vmem:[%s2041_s27 + $0x80] ss:$0 sps:$4 sm:$0x11]  }
  0x2b   : > { %713 = vrot.lane.b32.xlu1 %v389_v38, %s1961_s4  ;;  %v425_v11 = vsel %vm353_vm1, %v420_v9, %v424_v10  ;;  %v436_v22 = vrot.slane %v434_v20, 1  ;;  %v439_v31 = vshrl.u32 %v2157_v23, 16  ;;  %v446_v33 = vshll.u32 %v1855_v27, 16  ;;  %v2220_v9 = vld [vmem:[%s2041_s27 + $0x78] sm:$0xff]  }
  0x2c   : > { %v432_v21 = vor.u32 %v431_v19, %v427_v18  ;;  %v599_v29 = vsel %vm578_vm0, %v597_v25, %v598_v26  ;;  %v443_v32 = vrot.slane %v441_v28, 1  ;;  %v600_v37 = vrot.slane %v2157_v23, 1  ;;  %v2238_v28 = vld [vmem:[%s2041_s27 + $0x84] sm:$0xff]  }
  0x2d   : > { %v448_v35 = vrot.slane %v446_v33, 1  ;;  %v453_v42 = vshll.u32 %v2182_v39, 16  ;;  %v451_v43 = vshrl.u32 %v2182_v39, 16  ;;  %v458_v45 = vshll.u32 %v1857_v41, 16 }
  0x2e   : > { %783 = vrot.lane.b32.xlu0 %v2044_v0, %s1962_s5  ;;  %v437_v24 = vsel %vm353_vm1, %v432_v21, %v436_v22  ;;  %v604_v52 = vrot.slane %v1857_v41, 1  ;;  %v465_v54 = vshll.u32 %v2195_v49, 16  ;;  %v463_v56 = vshrl.u32 %v2195_v49, 16 }
  0x2f   : > { %785 = vrot.lane.b32.xlu1 %v2073_v30, %s1962_s5  ;;  %v460_v47 = vrot.slane %v458_v45, 1  ;;  %v470_v58 = vshll.u32 %v1859_v53, 16  ;;  %v606_v6 = vrot.slane %v2195_v49, 1  ;;  %v607_v7 = vrot.slane %v1859_v53, 1 }
  0x30   : > { %v467_v57 = vrot.slane %v465_v54, 1  ;;  %v475_v19 = vshrl.u32 %v2220_v9, 16  ;;  %v482_v21 = vshll.u32 %v1863_v13, 16  ;;  %v609_v33 = vrot.slane %v2220_v9, 1 }
  0x31   : > { %v472_v63 = vrot.slane %v470_v58, 1  ;;  %v487_v45 = vshrl.u32 %v2238_v28, 16 }
  0x32   : > { %830 = vrot.lane.b32.xlu0 %v389_v38, %s1963_s6  ;;  %v468_v62 = vor.u32 %v467_v57, %v463_v56 }
  0x33   : > { %832 = vrot.lane.b32.xlu1 %v401_v44, %s1963_s6 }
  0x34   : > { %v473_v4 = vsel %vm353_vm1, %v468_v62, %v472_v63 }
  0x36   : > { %865 = vrot.lane.b32.xlu0 %v587_v34, %s1964_s18 }
  0x37   : > { %550 = vrot.lane.b32.xlu1 %v389_v38, %s1960_s3  ;;  %v601_v38 = vrot.slane %v1855_v27, 1 }
  0x39   : > { %v602_v40 = vsel %vm578_vm0, %v600_v37, %v601_v38  ;;  %v610_v37 = vrot.slane %v1863_v13, 1  ;;  %v1866_v38 = vld [vmem:[%s2041_s27 + $0x8c] ss:$0 sps:$4 sm:$0x11]  }
  0x3a   : > { %867 = vrot.lane.b32.xlu0 %v590_v51, %s1964_s18 }
  0x3b   : > { %552 = vrot.lane.b32.xlu1 %v401_v44, %s1960_s3 }
  0x3e   : > { %631 = vrot.lane.b32.xlu0 %v587_v34, %s1959_s30  ;;  %v444_v34 = vor.u32 %v443_v32, %v439_v31 }
  0x3f   : > { %633 = vrot.lane.b32.xlu1 %v590_v51, %s1959_s30 }
  0x40   : > { %v449_v36 = vsel %vm353_vm1, %v444_v34, %v448_v35 }
  0x42   : > { %668 = vrot.lane.b32.xlu0 %v2073_v30, %s1957_s28 }
  0x43   : > { %670 = vrot.lane.b32.xlu1 %v2100_v48, %s1957_s28 }
  0x46   : > { %715 = vrot.lane.b32.xlu0 %v401_v44, %s1961_s4  ;;  %v455_v44 = vrot.slane %v453_v42, 1 }
  0x47   : > { %717 = vrot.lane.b32.xlu1 %v413_v61, %s1961_s4 }
  0x48   : > { %v456_v46 = vor.u32 %v455_v44, %v451_v43 }
  0x4a   : > { %750 = vrot.lane.b32.xlu0 %v590_v51, %s1958_s29  ;;  %v461_v50 = vsel %vm353_vm1, %v456_v46, %v460_v47  ;;  %v603_v51 = vrot.slane %v2182_v39, 1 }
  0x4b   : > { %752 = vrot.lane.b32.xlu1 %v593_v5, %s1958_s29 }
  0x4c   : > { %v605_v55 = vsel %vm578_vm0, %v603_v51, %v604_v52  ;;  %v494_v52 = vshll.u32 %v1866_v38, 16 }
  0x4e   : > { %787 = vrot.lane.b32.xlu0 %v2100_v48, %s1962_s5 }
  0x4f   : > { %789 = vrot.lane.b32.xlu1 %v2119_v60, %s1962_s5 }
  0x52   : > { %834 = vrot.lane.b32.xlu0 %v413_v61, %s1963_s6 }
  0x53   : > { %836 = vrot.lane.b32.xlu1 %v425_v11, %s1963_s6 }
  0x56   : > { %869 = vrot.lane.b32.xlu0 %v593_v5, %s1964_s18 }
  0x57   : > { %554 = vrot.lane.b32.xlu1 %v413_v61, %s1960_s3 }
  0x5a   : > { %871 = vrot.lane.b32.xlu0 %v596_v15, %s1964_s18 }
  0x5b   : > { %556 = vrot.lane.b32.xlu1 %v425_v11, %s1960_s3 }
  0x5e   : > { %635 = vrot.lane.b32.xlu0 %v593_v5, %s1959_s30 }
  0x5f   : > { %637 = vrot.lane.b32.xlu1 %v596_v15, %s1959_s30 }
  0x62   : > { %672 = vrot.lane.b32.xlu0 %v2119_v60, %s1957_s28 }
  0x63   : > { %674 = vrot.lane.b32.xlu1 %v2144_v14, %s1957_s28 }
  0x66   : > { %719 = vrot.lane.b32.xlu0 %v425_v11, %s1961_s4  ;;  %v608_v11 = vsel %vm578_vm0, %v606_v6, %v607_v7  ;;  %v612_v6 = vrot.slane %v2238_v28, 1  ;;  %v613_v7 = vrot.slane %v1866_v38, 1 }
  0x67   : > { %721 = vrot.lane.b32.xlu1 %v437_v24, %s1961_s4 }
  0x6a   : > { %754 = vrot.lane.b32.xlu0 %v596_v15, %s1958_s29  ;;  %v477_v15 = vshll.u32 %v2220_v9, 16 }
  0x6b   : > { %756 = vrot.lane.b32.xlu1 %v599_v29, %s1958_s29 }
  0x6c   : > { %v479_v20 = vrot.slane %v477_v15, 1  ;;  %v1868_v15 = vld [vmem:[%s2041_s27 + $0x98] ss:$0 sps:$4 sm:$0x11]  }
  0x6e   : > { %791 = vrot.lane.b32.xlu0 %v2144_v14, %s1962_s5  ;;  %v480_v27 = vor.u32 %v479_v20, %v475_v19 }
  0x6f   : > { %793 = vrot.lane.b32.xlu1 %v2157_v23, %s1962_s5 }
  0x72   : > { %838 = vrot.lane.b32.xlu0 %v437_v24, %s1963_s6 }
  0x73   : > { %840 = vrot.lane.b32.xlu1 %v449_v36, %s1963_s6 }
  0x76   : > { %873 = vrot.lane.b32.xlu0 %v599_v29, %s1964_s18 }
  0x77   : > { %558 = vrot.lane.b32.xlu1 %v437_v24, %s1960_s3 }
  0x7a   : > { %875 = vrot.lane.b32.xlu0 %v602_v40, %s1964_s18 }
  0x7b   : > { %560 = vrot.lane.b32.xlu1 %v449_v36, %s1960_s3 }
  0x7e   : > { %639 = vrot.lane.b32.xlu0 %v599_v29, %s1959_s30 }
  0x7f   : > { %641 = vrot.lane.b32.xlu1 %v602_v40, %s1959_s30 }
  0x82   : > { %676 = vrot.lane.b32.xlu0 %v2157_v23, %s1957_s28 }
  0x83   : > { %678 = vrot.lane.b32.xlu1 %v2182_v39, %s1957_s28 }
  0x86   : > { %723 = vrot.lane.b32.xlu0 %v449_v36, %s1961_s4 }
  0x87   : > { %725 = vrot.lane.b32.xlu1 %v461_v50, %s1961_s4 }
  0x8a   : > { %758 = vrot.lane.b32.xlu0 %v602_v40, %s1958_s29  ;;  %v489_v40 = vshll.u32 %v2238_v28, 16 }
  0x8b   : > { %760 = vrot.lane.b32.xlu1 %v605_v55, %s1958_s29 }
  0x8c   : > { %v667_v59 = vpop.permute.xlu1 %666  ;;  %v665_v61 = vpop.permute.xlu0 %664  ;;  %v491_v51 = vrot.slane %v489_v40, 1 }
  0x8e   : > { %795 = vrot.lane.b32.xlu0 %v2182_v39, %s1962_s5 }
  0x8f   : > { %797 = vrot.lane.b32.xlu1 %v2195_v49, %s1962_s5 }
  0x90   : > { %v747_v2 = vpop.permute.xlu0 %746 }
  0x91   : > { %v628_v5 = vpop.permute.xlu1 %627 }
  0x92   : > { %842 = vrot.lane.b32.xlu0 %v461_v50, %s1963_s6 }
  0x93   : > { %844 = vrot.lane.b32.xlu1 %v473_v4, %s1963_s6 }
  0x94   : > { %v547_v8 = vpop.permute.xlu0 %546 }
  0x95   : > { %v630_v10 = vpop.permute.xlu1 %629  ;;  %v899_v17 = vsel %vm897_vm3, %v2053_v3, %v547_v8  ;;  %v484_v3 = vrot.slane %v482_v21, 1  ;;  %v506_v21 = vshll.u32 %v1868_v15, 16 }
  0x96   : > { %877 = vrot.lane.b32.xlu0 %v605_v55, %s1964_s18  ;;  %v932_v25 = vsel %vm930_vm4, %v899_v17, %v628_v5 }
  0x97   : > { %562 = vrot.lane.b32.xlu1 %v461_v50, %s1960_s3  ;;  %v965_v32 = vsel %vm963_vm5, %v932_v25, %v665_v61  ;;  %v485_v36 = vsel %vm353_vm1, %v480_v27, %v484_v3  ;;  %v611_v50 = vsel %vm578_vm0, %v609_v33, %v610_v37  ;;  %v496_v61 = vrot.slane %v494_v52, 1  ;;  %v2291_v27 = vld [vmem:[%s2041_s27 + $0x9c] sm:$0xff]  }
  0x98   : > { %v549_v12 = vpop.permute.xlu0 %548  ;;  %v513_v37 = vshll.u32 %v2291_v27, 16 }
  0x99   : > { %v749_v16 = vpop.permute.xlu1 %748  ;;  %v901_v24 = vsel %vm897_vm3, %v2047_v1, %v549_v12  ;;  %v614_v12 = vsel %vm578_vm0, %v612_v6, %v613_v7  ;;  %v618_v6 = vrot.slane %v2291_v27, 1 }
  0x9a   : > { %879 = vrot.lane.b32.xlu0 %v608_v11, %s1964_s18  ;;  %v934_v29 = vsel %vm930_vm4, %v901_v24, %v630_v10  ;;  %v2278_v10 = vld [vmem:[%s2041_s27 + $0x90] sm:$0xff]  }
  0x9b   : > { %564 = vrot.lane.b32.xlu1 %v473_v4, %s1960_s3  ;;  %v967_v34 = vsel %vm963_vm5, %v934_v29, %v667_v59  ;;  %v492_v59 = vor.u32 %v491_v51, %v487_v45  ;;  %v499_v19 = vshrl.u32 %v2278_v10, 16  ;;  %v511_v45 = vshrl.u32 %v2291_v27, 16 }
  0x9c   : > { %v712_v18 = vpop.permute.xlu0 %711 }
  0x9d   : > { %v714_v22 = vpop.permute.xlu1 %713  ;;  %v998_v1 = vsel %vm996_vm6, %v965_v32, %v712_v18  ;;  %v615_v32 = vrot.slane %v2278_v10, 1 }
  0x9e   : > { %643 = vrot.lane.b32.xlu0 %v605_v55, %s1959_s30  ;;  %v1031_v42 = vsel %vm1029_vm7, %v998_v1, %v747_v2  ;;  %v1000_v43 = vsel %vm996_vm6, %v967_v34, %v714_v22  ;;  %v616_v1 = vrot.slane %v1868_v15, 1 }
  0x9f   : > { %645 = vrot.lane.b32.xlu1 %v608_v11, %s1959_s30  ;;  %v1033_v55 = vsel %vm1029_vm7, %v1000_v43, %v749_v16  ;;  %v501_v16 = vshll.u32 %v2278_v10, 16 }
  0xa0   : > { %v784_v26 = vpop.permute.xlu0 %783 }
  0xa1   : > { %v786_v31 = vpop.permute.xlu1 %785  ;;  %v1064_v44 = vsel %vm1062_vm8, %v1031_v42, %v784_v26  ;;  %v503_v20 = vrot.slane %v501_v16, 1  ;;  %v508_v26 = vrot.slane %v506_v21, 1  ;;  %v1872_v16 = vld [vmem:[%s2041_s27 + $0xb0] ss:$0 sps:$4 sm:$0x11]  }
  0xa2   : > { %680 = vrot.lane.b32.xlu0 %v2195_v49, %s1957_s28  ;;  %v1066_v56 = vsel %vm1062_vm8, %v1033_v55, %v786_v31 }
  0xa3   : > { %682 = vrot.lane.b32.xlu1 %v2220_v9, %s1957_s28  ;;  %v504_v25 = vor.u32 %v503_v20, %v499_v19 }
  0xa4   : > { %v831_v35 = vpop.permute.xlu0 %830 }
  0xa5   : > { %v833_v41 = vpop.permute.xlu1 %832  ;;  %v1097_v46 = vsel %vm1095_vm9, %v1064_v44, %v831_v35  ;;  %v509_v35 = vsel %vm353_vm1, %v504_v25, %v508_v26  ;;  %v617_v44 = vsel %vm578_vm0, %v615_v32, %v616_v1 }
  0xa6   : > { %727 = vrot.lane.b32.xlu0 %v473_v4, %s1961_s4  ;;  %v1099_v57 = vsel %vm1095_vm9, %v1066_v56, %v833_v41  ;;  %v497_v4 = vsel %vm353_vm1, %v492_v59, %v496_v61 }
  0xa7   : > { %729 = vrot.lane.b32.xlu1 %v485_v36, %s1961_s4 }
  0xa8   : > { %v866_v47 = vpop.permute.xlu0 %865 }
  0xa9   : > { %v551_v53 = vpop.permute.xlu1 %550  ;;  %v1130_v54 = vsel %vm1128_vm10, %v1097_v46, %v866_v47 }
  0xaa   : > { %762 = vrot.lane.b32.xlu0 %v608_v11, %s1958_s29  ;;  %1736 = vmatprep.mubr.msk.bf16.mxu0 %vm1181_vm11, %v1130_v54  ;;  %v903_v29 = vsel %vm897_vm3, %v2044_v0, %v551_v53 }
  0xab   : > { %764 = vrot.lane.b32.xlu1 %v611_v50, %s1958_s29 }
  0xac   : > { %v868_v58 = vpop.permute.xlu0 %867 }
  0xad   : > { %v553_v62 = vpop.permute.xlu1 %552  ;;  %v1132_v63 = vsel %vm1128_vm10, %v1099_v57, %v868_v58 }
  0xae   : > { %799 = vrot.lane.b32.xlu0 %v2220_v9, %s1962_s5  ;;  %1737 = vmatmul.mubr.msk.bf16.vlgmr.msra.gmra.mxu0 %vm1181_vm11, %v1132_v63  ;;  %v905_v40 = vsel %vm897_vm3, %v2073_v30, %v553_v62  ;;  %v515_v30 = vrot.slane %v513_v37, 1 }
  0xaf   : > { %801 = vrot.lane.b32.xlu1 %v2238_v28, %s1962_s5 }
  0xb0   : > { %v632_v2 = vpop.permute.xlu0 %631  ;;  %v516_v59 = vor.u32 %v515_v30, %v511_v45 }
  0xb1   : > { %v634_v5 = vpop.permute.xlu1 %633  ;;  %v936_v31 = vsel %vm930_vm4, %v903_v29, %v632_v2  ;;  %v2349_v29 = vld [vmem:[%s2041_s27 + $0xb4] sm:$0xff]  }
  0xb2   : > { %846 = vrot.lane.b32.xlu0 %v485_v36, %s1963_s6  ;;  %v938_v42 = vsel %vm930_vm4, %v905_v40, %v634_v5 }
  0xb3   : > { %848 = vrot.lane.b32.xlu1 %v497_v4, %s1963_s6 }
  0xb4   : > { %v669_v8 = vpop.permute.xlu0 %668 }
  0xb5   : > { %v671_v11 = vpop.permute.xlu1 %670  ;;  %v969_v33 = vsel %vm963_vm5, %v936_v31, %v669_v8 }
  0xb6   : > { %881 = vrot.lane.b32.xlu0 %v611_v50, %s1964_s18  ;;  %v971_v46 = vsel %vm963_vm5, %v938_v42, %v671_v11  ;;  %v2336_v11 = vld [vmem:[%s2041_s27 + $0xa8] sm:$0xff]  }
  0xb7   : > { %566 = vrot.lane.b32.xlu1 %v485_v36, %s1960_s3  ;;  %v1870_v36 = vld [vmem:[%s2041_s27 + $0xa4] ss:$0 sps:$4 sm:$0x11]   ;;  %v523_v20 = vshrl.u32 %v2336_v11, 16 }
  0xb8   : > { %v716_v13 = vpop.permute.xlu0 %715  ;;  %v518_v51 = vshll.u32 %v1870_v36, 16  ;;  %v619_v7 = vrot.slane %v1870_v36, 1 }
  0xb9   : > { %v718_v17 = vpop.permute.xlu1 %717  ;;  %v1002_v0 = vsel %vm996_vm6, %v969_v33, %v716_v13  ;;  %v621_v33 = vrot.slane %v2336_v11, 1 }
  0xba   : > { %883 = vrot.lane.b32.xlu0 %v614_v12, %s1964_s18  ;;  %v1004_v52 = vsel %vm996_vm6, %v971_v46, %v718_v17  ;;  %v520_v61 = vrot.slane %v518_v51, 1  ;;  %v620_v13 = vsel %vm578_vm0, %v618_v6, %v619_v7  ;;  %v525_v17 = vshll.u32 %v2336_v11, 16 }
  0xbb   : > { %568 = vrot.lane.b32.xlu1 %v497_v4, %s1960_s3  ;;  %v535_v46 = vshrl.u32 %v2349_v29, 16  ;;  %v624_v6 = vrot.slane %v2349_v29, 1 }
  0xbc   : > { %v751_v18 = vpop.permute.xlu0 %750  ;;  %v527_v21 = vrot.slane %v525_v17, 1  ;;  %v1876_v17 = vld [vmem:[%s2041_s27 + $0xc8] ss:$0 sps:$4 sm:$0x11]  }
  0xbd   : > { %v753_v22 = vpop.permute.xlu1 %752  ;;  %v1035_v41 = vsel %vm1029_vm7, %v1002_v0, %v751_v18  ;;  %v1874_v0 = vld [vmem:[%s2041_s27 + $0xbc] ss:$0 sps:$4 sm:$0x11]  }
  0xbe   : > { %647 = vrot.lane.b32.xlu0 %v611_v50, %s1959_s30  ;;  %v1037_v55 = vsel %vm1029_vm7, %v1004_v52, %v753_v22  ;;  %v530_v22 = vshll.u32 %v1872_v16, 16  ;;  %v528_v26 = vor.u32 %v527_v21, %v523_v20  ;;  %v542_v51 = vshll.u32 %v1874_v0, 16 }
  0xbf   : > { %649 = vrot.lane.b32.xlu1 %v614_v12, %s1959_s30  ;;  %v625_v7 = vrot.slane %v1874_v0, 1 }
  0xc0   : > { %v788_v24 = vpop.permute.xlu0 %787 }
  0xc1   : > { %v790_v3 = vpop.permute.xlu1 %789  ;;  %v1068_v43 = vsel %vm1062_vm8, %v1035_v41, %v788_v24 }
  0xc2   : > { %684 = vrot.lane.b32.xlu0 %v2238_v28, %s1957_s28  ;;  %v1070_v56 = vsel %vm1062_vm8, %v1037_v55, %v790_v3  ;;  %v532_v3 = vrot.slane %v530_v22, 1 }
  0xc3   : > { %686 = vrot.lane.b32.xlu1 %v2278_v10, %s1957_s28 }
  0xc4   : > { %v835_v34 = vpop.permute.xlu0 %834  ;;  %v533_v37 = vsel %vm353_vm1, %v528_v26, %v532_v3 }
  0xc5   : > { %v837_v38 = vpop.permute.xlu1 %836  ;;  %v1101_v47 = vsel %vm1095_vm9, %v1068_v43, %v835_v34  ;;  %v622_v34 = vrot.slane %v1872_v16, 1 }
  0xc6   : > { %731 = vrot.lane.b32.xlu0 %v497_v4, %s1961_s4  ;;  %v1103_v57 = vsel %vm1095_vm9, %v1070_v56, %v837_v38  ;;  %v521_v4 = vsel %vm353_vm1, %v516_v59, %v520_v61  ;;  %v537_v38 = vshll.u32 %v2349_v29, 16  ;;  %v544_v61 = vrot.slane %v542_v51, 1 }
  0xc7   : > { %733 = vrot.lane.b32.xlu1 %v509_v35, %s1961_s4  ;;  %v623_v45 = vsel %vm578_vm0, %v621_v33, %v622_v34 }
  0xc8   : > { %v870_v50 = vpop.permute.xlu0 %869 }
  0xc9   : > { %v555_v53 = vpop.permute.xlu1 %554  ;;  %v1134_v54 = vsel %vm1128_vm10, %v1101_v47, %v870_v50 }
  0xca   : > { %766 = vrot.lane.b32.xlu0 %v614_v12, %s1958_s29  ;;  %1740 = vmatprep.mubr.msk.bf16.mxu0 %vm1181_vm11, %v1134_v54  ;;  %v907_v32 = vsel %vm897_vm3, %v2100_v48, %v555_v53 }
  0xcb   : > { %768 = vrot.lane.b32.xlu1 %v617_v44, %s1958_s29 }
  0xcc   : > { %v872_v58 = vpop.permute.xlu0 %871 }
  0xcd   : > { %v557_v62 = vpop.permute.xlu1 %556  ;;  %v1136_v63 = vsel %vm1128_vm10, %v1103_v57, %v872_v58 }
  0xce   : > { %803 = vrot.lane.b32.xlu0 %v2278_v10, %s1962_s5  ;;  %1741 = vmatmul.mubr.msk.bf16.gmra.mxu0 %vm1181_vm11, %v1136_v63  ;;  %v909_v41 = vsel %vm897_vm3, %v2119_v60, %v557_v62  ;;  %v539_v60 = vrot.slane %v537_v38, 1 }
  0xcf   : > { %805 = vrot.lane.b32.xlu1 %v2291_v27, %s1962_s5 }
  0xd0   : > { %v636_v2 = vpop.permute.xlu0 %635  ;;  %v540_v59 = vor.u32 %v539_v60, %v535_v46 }
  0xd1   : > { %v638_v5 = vpop.permute.xlu1 %637  ;;  %v940_v1 = vsel %vm930_vm4, %v907_v32, %v636_v2  ;;  %v1877_v32 = vld [vmem:[%s2041_s27 + $0xcc] sm:$0xff]  }
  0xd2   : > { %850 = vrot.lane.b32.xlu0 %v509_v35, %s1963_s6  ;;  %v942_v43 = vsel %vm930_vm4, %v909_v41, %v638_v5 }
  0xd3   : > { %852 = vrot.lane.b32.xlu1 %v521_v4, %s1963_s6 }
  0xd4   : > { %v673_v8 = vpop.permute.xlu0 %672 }
  0xd5   : > { %v675_v12 = vpop.permute.xlu1 %674 }
  0xd6   : > { %885 = vrot.lane.b32.xlu0 %v617_v44, %s1964_s18  ;;  %v975_v47 = vsel %vm963_vm5, %v942_v43, %v675_v12  ;;  %v2394_v12 = vld [vmem:[%s2041_s27 + $0xc0] sm:$0xff]  }
  0xd7   : > { %570 = vrot.lane.b32.xlu1 %v509_v35, %s1960_s3  ;;  %v973_v35 = vsel %vm963_vm5, %v940_v1, %v673_v8  ;;  %v700_v21 = vshrl.u32 %v2394_v12, 16 }
  0xd8   : > { %v720_v15 = vpop.permute.xlu0 %719 }
  0xd9   : > { %v722_v18 = vpop.permute.xlu1 %721  ;;  %v1006_v48 = vsel %vm996_vm6, %v973_v35, %v720_v15  ;;  %v626_v15 = vsel %vm578_vm0, %v624_v6, %v625_v7  ;;  %v743_v35 = vrot.slane %v2394_v12, 1 }
  0xda   : > { %887 = vrot.lane.b32.xlu0 %v620_v13, %s1964_s18  ;;  %v1008_v52 = vsel %vm996_vm6, %v975_v47, %v722_v18  ;;  %v702_v18 = vshll.u32 %v2394_v12, 16  ;;  %v819_v47 = vshrl.u32 %v1877_v32, 16 }
  0xdb   : > { %572 = vrot.lane.b32.xlu1 %v521_v4, %s1960_s3 }
  0xdc   : > { %v755_v19 = vpop.permute.xlu0 %754  ;;  %v704_v22 = vrot.slane %v702_v18, 1 }
  0xdd   : > { %v757_v24 = vpop.permute.xlu1 %756  ;;  %v1039_v42 = vsel %vm1029_vm7, %v1006_v48, %v755_v19  ;;  %v1878_v48 = vld [vmem:[%s2041_s27 + $0xd4] ss:$0 sps:$4 sm:$0x11]   ;;  %s160_s27 = scalar_lea.vmem [#allocation2], %s1650_s25 }
  0xde   : > { %651 = vrot.lane.b32.xlu0 %v617_v44, %s1959_s30  ;;  %v1041_v55 = vsel %vm1029_vm7, %v1008_v52, %v757_v24  ;;  %v707_v24 = vshll.u32 %v1876_v17, 16  ;;  %v705_v3 = vor.u32 %v704_v22, %v700_v21  ;;  %v863_v6 = vrot.slane %v1878_v48, 1 }
  0xdf   : > { %653 = vrot.lane.b32.xlu1 %v620_v13, %s1959_s30 }
  0xe0   : > { %v792_v25 = vpop.permute.xlu0 %791 }
  0xe1   : > { %v794_v31 = vpop.permute.xlu1 %793  ;;  %v1072_v44 = vsel %vm1062_vm8, %v1039_v42, %v792_v25 }
  0xe2   : > { %688 = vrot.lane.b32.xlu0 %v2291_v27, %s1957_s28  ;;  %v1074_v56 = vsel %vm1062_vm8, %v1041_v55, %v794_v31  ;;  %v709_v31 = vrot.slane %v707_v24, 1 }
  0xe3   : > { %690 = vrot.lane.b32.xlu1 %v2336_v11, %s1957_s28 }
  0xe4   : > { %v839_v36 = vpop.permute.xlu0 %838  ;;  %v710_v38 = vsel %vm353_vm1, %v705_v3, %v709_v31 }
  0xe5   : > { %v841_v40 = vpop.permute.xlu1 %840  ;;  %v1105_v50 = vsel %vm1095_vm9, %v1072_v44, %v839_v36  ;;  %v744_v36 = vrot.slane %v1876_v17, 1 }
  0xe6   : > { %735 = vrot.lane.b32.xlu0 %v521_v4, %s1961_s4  ;;  %v1107_v57 = vsel %vm1095_vm9, %v1074_v56, %v841_v40  ;;  %v545_v4 = vsel %vm353_vm1, %v540_v59, %v544_v61  ;;  %v821_v40 = vshll.u32 %v1877_v32, 16 }
  0xe7   : > { %737 = vrot.lane.b32.xlu1 %v533_v37, %s1961_s4  ;;  %v745_v46 = vsel %vm578_vm0, %v743_v35, %v744_v36 }
  0xe8   : > { %v874_v30 = vpop.permute.xlu0 %873  ;;  %v823_v51 = vrot.slane %v821_v40, 1 }
  0xe9   : > { %v559_v53 = vpop.permute.xlu1 %558  ;;  %v1138_v54 = vsel %vm1128_vm10, %v1105_v50, %v874_v30 }
  0xea   : > { %770 = vrot.lane.b32.xlu0 %v620_v13, %s1958_s29  ;;  %1744 = vmatprep.mubr.msk.bf16.mxu0 %vm1181_vm11, %v1138_v54  ;;  %v911_v33 = vsel %vm897_vm3, %v2144_v14, %v559_v53  ;;  %v824_v59 = vor.u32 %v823_v51, %v819_v47 }
  0xeb   : > { %772 = vrot.lane.b32.xlu1 %v623_v45, %s1958_s29 }
  0xec   : > { %v876_v58 = vpop.permute.xlu0 %875 }
  0xed   : > { %v561_v62 = vpop.permute.xlu1 %560  ;;  %v1140_v63 = vsel %vm1128_vm10, %v1107_v57, %v876_v58 }
  0xee   : > { %807 = vrot.lane.b32.xlu0 %v2336_v11, %s1962_s5  ;;  %1745 = vmatmul.mubr.msk.bf16.gmra.mxu0 %vm1181_vm11, %v1140_v63  ;;  %v913_v42 = vsel %vm897_vm3, %v2157_v23, %v561_v62  ;;  %v826_v23 = vshll.u32 %v1878_v48, 16 }
  0xef   : > { %809 = vrot.lane.b32.xlu1 %v2349_v29, %s1962_s5 }
  0xf0   : > { %v640_v2 = vpop.permute.xlu0 %639  ;;  %v828_v61 = vrot.slane %v826_v23, 1 }
  0xf1   : > { %v642_v5 = vpop.permute.xlu1 %641  ;;  %v944_v34 = vsel %vm930_vm4, %v911_v33, %v640_v2 }
  0xf2   : > { %854 = vrot.lane.b32.xlu0 %v533_v37, %s1963_s6  ;;  %v946_v44 = vsel %vm930_vm4, %v913_v42, %v642_v5  ;;  %v862_v5 = vrot.slane %v1877_v32, 1 }
  0xf3   : > { %856 = vrot.lane.b32.xlu1 %v545_v4, %s1963_s6 }
  0xf4   : > { %v677_v8 = vpop.permute.xlu0 %676 }
  0xf5   : > { %v679_v13 = vpop.permute.xlu1 %678 }
  0xf6   : > { %889 = vrot.lane.b32.xlu0 %v623_v45, %s1964_s18  ;;  %v979_v50 = vsel %vm963_vm5, %v946_v44, %v679_v13  ;;  %v864_v13 = vsel %vm578_vm0, %v862_v5, %v863_v6 }
  0xf7   : > { %574 = vrot.lane.b32.xlu1 %v533_v37, %s1960_s3  ;;  %v977_v37 = vsel %vm963_vm5, %v944_v34, %v677_v8 }
  0xf8   : > { %v724_v16 = vpop.permute.xlu0 %723 }
  0xf9   : > { %v726_v19 = vpop.permute.xlu1 %725  ;;  %v1010_v14 = vsel %vm996_vm6, %v977_v37, %v724_v16 }
  0xfa   : > { %891 = vrot.lane.b32.xlu0 %v626_v15, %s1964_s18  ;;  %v1012_v52 = vsel %vm996_vm6, %v979_v50, %v726_v19 }
  0xfb   : > { %576 = vrot.lane.b32.xlu1 %v545_v4, %s1960_s3  ;;  %s2597_s3 = scalar_lea.hbm %s2639_s2, %s1708_s26 }
  0xfc   : > { %v759_v20 = vpop.permute.xlu0 %758 }
  0xfd   : > { %v761_v25 = vpop.permute.xlu1 %760  ;;  %v1043_v43 = vsel %vm1029_vm7, %v1010_v14, %v759_v20 }
  0xfe   : > { %655 = vrot.lane.b32.xlu0 %v623_v45, %s1959_s30  ;;  %v1045_v55 = vsel %vm1029_vm7, %v1012_v52, %v761_v25 }
  0xff   : > { %657 = vrot.lane.b32.xlu1 %v626_v15, %s1959_s30 }
 0x100   : > { %v796_v26 = vpop.permute.xlu0 %795 }
 0x101   : > { %v798_v1 = vpop.permute.xlu1 %797  ;;  %v1076_v45 = vsel %vm1062_vm8, %v1043_v43, %v796_v26 }
 0x102   : > { %692 = vrot.lane.b32.xlu0 %v2349_v29, %s1957_s28  ;;  %v1078_v56 = vsel %vm1062_vm8, %v1045_v55, %v798_v1 }
 0x103   : > { %694 = vrot.lane.b32.xlu1 %v2394_v12, %s1957_s28  ;;  %s1568_s28 = sshll.u32 %s160_s27, 4  ;;  %s1569_s28 = int_to_ptr.vmem [resolvable:$true] %s1568_s28 }
 0x104   : > { %v843_v0 = vpop.permute.xlu0 %842 }
 0x105   : > { %v845_v41 = vpop.permute.xlu1 %844  ;;  %v1109_v30 = vsel %vm1095_vm9, %v1076_v45, %v843_v0 }
 0x106   : > { %739 = vrot.lane.b32.xlu0 %v545_v4, %s1961_s4  ;;  %v1111_v57 = vsel %vm1095_vm9, %v1078_v56, %v845_v41  ;;  %v829_v4 = vsel %vm353_vm1, %v824_v59, %v828_v61 }
 0x107   : > { %741 = vrot.lane.b32.xlu1 %v710_v38, %s1961_s4  ;;  %s1554_s4 = scalar_lea.sflag [#allocation3], %s158_s24 }
 0x108   : > { %v878_v60 = vpop.permute.xlu0 %877 }
 0x109   : > { %v563_v53 = vpop.permute.xlu1 %562  ;;  %v1142_v54 = vsel %vm1128_vm10, %v1109_v30, %v878_v60 }
 0x10a   : > { %774 = vrot.lane.b32.xlu0 %v626_v15, %s1958_s29  ;;  %1748 = vmatprep.mubr.msk.bf16.mxu0 %vm1181_vm11, %v1142_v54  ;;  %v915_v21 = vsel %vm897_vm3, %v2182_v39, %v563_v53 }
 0x10b   : > { %776 = vrot.lane.b32.xlu1 %v745_v46, %s1958_s29 }
 0x10c   : > { %v880_v58 = vpop.permute.xlu0 %879 }
 0x10d   : > { %v565_v62 = vpop.permute.xlu1 %564  ;;  %v1144_v63 = vsel %vm1128_vm10, %v1111_v57, %v880_v58 }
 0x10e   : > { %811 = vrot.lane.b32.xlu0 %v2394_v12, %s1962_s5  ;;  %1749 = vmatmul.mubr.msk.bf16.gmra.mxu0 %vm1181_vm11, %v1144_v63  ;;  %v917_v31 = vsel %vm897_vm3, %v2195_v49, %v565_v62 }
 0x10f   : > { %813 = vrot.lane.b32.xlu1 %v1877_v32, %s1962_s5  ;;  %s1879_s5 = scalar_lea.vmem %s1569_s28, 32 }
 0x110   : > { %v644_v2 = vpop.permute.xlu0 %643  ;;  %p1880_p12 = scmp.ne.s32.totalorder %s1569_s28, %s1879_s5 }
 0x111   : > { %v646_v7 = vpop.permute.xlu1 %645  ;;  %v948_v22 = vsel %vm930_vm4, %v915_v21, %v644_v2 }
 0x112   : > { %858 = vrot.lane.b32.xlu0 %v710_v38, %s1963_s6  ;;  %v950_v1 = vsel %vm930_vm4, %v917_v31, %v646_v7  ;;  %p1881_p13 = pnand %p1880_p12, %p2021_p4 }
 0x113   : > { %860 = vrot.lane.b32.xlu1 %v829_v4, %s1963_s6  ;;  %s1883_s6 = sshll.u32 %s1965_s12, 4  ;;  %s1884_s6 = int_to_ptr.vmem [resolvable:$false] %s1883_s6 }
 0x114   : > { %v681_v8 = vpop.permute.xlu0 %680  ;;  %p1882_p0 = pneg %p1881_p13  ;;  %s1885_s7 = scalar_lea.vmem %s1884_s6, 64 }
 0x115   : > { %v683_v15 = vpop.permute.xlu1 %682  ;;  %v981_v24 = vsel %vm963_vm5, %v948_v22, %v681_v8  ;;  %p1886_p1 = scmp.lt.s32.totalorder %s1569_s28, %s1884_s6  ;;  %p1887_p2 = scmp.lt.s32.totalorder %s1885_s7, %s1879_s5 }
 0x116   : > { %893 = vrot.lane.b32.xlu0 %v745_v46, %s1964_s18  ;;  %v983_v34 = vsel %vm963_vm5, %v950_v1, %v683_v15 }
 0x117   : > { %895 = vrot.lane.b32.xlu1 %v864_v13, %s1964_s18  ;;  %p1888_p3 = por %p1887_p2, %p1886_p1 }
 0x118   : > { %v728_v12 = vpop.permute.xlu0 %727 }
 0x119   : > { %v730_v16 = vpop.permute.xlu1 %729  ;;  %v1014_v26 = vsel %vm996_vm6, %v981_v24, %v728_v12  ;;  %p1889_p5 = pnand %p1888_p3, %p1882_p0 }
 0x11a   : > { %v1016_v36 = vsel %vm996_vm6, %v983_v34, %v730_v16 }
 0x11c   : > { %v763_v17 = vpop.permute.xlu0 %762 }
 0x11d   : > { %v765_v18 = vpop.permute.xlu1 %764  ;;  %v1047_v32 = vsel %vm1029_vm7, %v1014_v26, %v763_v17 }
 0x11e   : > { %v1049_v38 = vsel %vm1029_vm7, %v1016_v36, %v765_v18 }
 0x120   : > { %v800_v19 = vpop.permute.xlu0 %799 }
 0x121   : > { %v802_v20 = vpop.permute.xlu1 %801  ;;  %v1080_v33 = vsel %vm1062_vm8, %v1047_v32, %v800_v19 }
 0x122   : > { %v1082_v49 = vsel %vm1062_vm8, %v1049_v38, %v802_v20 }
 0x124   : > { %v847_v25 = vpop.permute.xlu0 %846 }
 0x125   : > { %v849_v3 = vpop.permute.xlu1 %848  ;;  %v1113_v39 = vsel %vm1095_vm9, %v1080_v33, %v847_v25 }
 0x126   : > { %v1115_v48 = vsel %vm1095_vm9, %v1082_v49, %v849_v3 }
 0x128   : > { %v882_v35 = vpop.permute.xlu0 %881 }
 0x129   : > { %v567_v37 = vpop.permute.xlu1 %566  ;;  %v1146_v0 = vsel %vm1128_vm10, %v1113_v39, %v882_v35 }
 0x12a   : > { %1752 = vmatprep.mubr.msk.bf16.mxu1 %vm1181_vm11, %v1146_v0  ;;  %v919_v23 = vsel %vm897_vm3, %v2220_v9, %v567_v37 }
 0x12c   : > { %v884_v40 = vpop.permute.xlu0 %883 }
 0x12d   : > { %v569_v14 = vpop.permute.xlu1 %568  ;;  %v1148_v41 = vsel %vm1128_vm10, %v1115_v48, %v884_v40 }
 0x12e   : > { %1753 = vmatmul.mubr.msk.bf16.vlgmr.msra.gmra.mxu1 %vm1181_vm11, %v1148_v41  ;;  %v921_v57 = vsel %vm897_vm3, %v2238_v28, %v569_v14 }
 0x130   : > { %v648_v42 = vpop.permute.xlu0 %647 }
 0x131   : > { %v650_v43 = vpop.permute.xlu1 %649  ;;  %v952_v52 = vsel %vm930_vm4, %v919_v23, %v648_v42 }
 0x132   : > { %v954_v59 = vsel %vm930_vm4, %v921_v57, %v650_v43 }
 0x134   : > { %v685_v44 = vpop.permute.xlu0 %684 }
 0x135   : > { %v687_v45 = vpop.permute.xlu1 %686  ;;  %v985_v53 = vsel %vm963_vm5, %v952_v52, %v685_v44 }
 0x136   : > { %v987_v62 = vsel %vm963_vm5, %v954_v59, %v687_v45 }
 0x138   : > { %v732_v46 = vpop.permute.xlu0 %731 }
 0x139   : > { %v734_v47 = vpop.permute.xlu1 %733  ;;  %v1018_v55 = vsel %vm996_vm6, %v985_v53, %v732_v46 }
 0x13a   : > { %v1020_v2 = vsel %vm996_vm6, %v987_v62, %v734_v47 }
 0x13c   : > { %v767_v50 = vpop.permute.xlu0 %766 }
 0x13d   : > { %v769_v30 = vpop.permute.xlu1 %768  ;;  %v1051_v58 = vsel %vm1029_vm7, %v1018_v55, %v767_v50 }
 0x13e   : > { %v1053_v6 = vsel %vm1029_vm7, %v1020_v2, %v769_v30 }
 0x140   : > { %v804_v60 = vpop.permute.xlu0 %803 }
 0x141   : > { %v806_v51 = vpop.permute.xlu1 %805  ;;  %v1084_v61 = vsel %vm1062_vm8, %v1051_v58, %v804_v60 }
 0x142   : > { %v1086_v28 = vsel %vm1062_vm8, %v1053_v6, %v806_v51 }
 0x144   : > { %v851_v54 = vpop.permute.xlu0 %850 }
 0x145   : > { %v853_v56 = vpop.permute.xlu1 %852  ;;  %v1117_v9 = vsel %vm1095_vm9, %v1084_v61, %v851_v54 }
 0x146   : > { %v1119_v7 = vsel %vm1095_vm9, %v1086_v28, %v853_v56 }
 0x148   : > { %v886_v63 = vpop.permute.xlu0 %885 }
 0x149   : > { %v571_v4 = vpop.permute.xlu1 %570  ;;  %v1150_v5 = vsel %vm1128_vm10, %v1117_v9, %v886_v63 }
 0x14a   : > { %1756 = vmatprep.mubr.msk.bf16.mxu1 %vm1181_vm11, %v1150_v5  ;;  %v923_v26 = vsel %vm897_vm3, %v2278_v10, %v571_v4 }
 0x14c   : > { %v888_v8 = vpop.permute.xlu0 %887 }
 0x14d   : > { %v573_v13 = vpop.permute.xlu1 %572  ;;  %v1152_v15 = vsel %vm1128_vm10, %v1119_v7, %v888_v8 }
 0x14e   : > { %1757 = vmatmul.mubr.msk.bf16.gmra.mxu1 %vm1181_vm11, %v1152_v15  ;;  %v925_v34 = vsel %vm897_vm3, %v2291_v27, %v573_v13 }
 0x150   : > { %v652_v12 = vpop.permute.xlu0 %651 }
 0x151   : > { %v654_v16 = vpop.permute.xlu1 %653  ;;  %v956_v3 = vsel %vm930_vm4, %v923_v26, %v652_v12 }
 0x152   : > { %v958_v35 = vsel %vm930_vm4, %v925_v34, %v654_v16 }
 0x154   : > { %v689_v17 = vpop.permute.xlu0 %688 }
 0x155   : > { %v691_v18 = vpop.permute.xlu1 %690  ;;  %v989_v31 = vsel %vm963_vm5, %v956_v3, %v689_v17 }
 0x156   : > { %v991_v37 = vsel %vm963_vm5, %v958_v35, %v691_v18 }
 0x158   : > { %v736_v19 = vpop.permute.xlu0 %735 }
 0x159   : > { %v738_v20 = vpop.permute.xlu1 %737  ;;  %v1022_v1 = vsel %vm996_vm6, %v989_v31, %v736_v19 }
 0x15a   : > { %v1024_v38 = vsel %vm996_vm6, %v991_v37, %v738_v20 }
 0x15c   : > { %v771_v21 = vpop.permute.xlu0 %770 }
 0x15d   : > { %v773_v22 = vpop.permute.xlu1 %772  ;;  %v1055_v39 = vsel %vm1029_vm7, %v1022_v1, %v771_v21 }
 0x15e   : > { %v1057_v40 = vsel %vm1029_vm7, %v1024_v38, %v773_v22 }
 0x160   : > { %v808_v24 = vpop.permute.xlu0 %807 }
 0x161   : > { %v810_v25 = vpop.permute.xlu1 %809  ;;  %v1088_v36 = vsel %vm1062_vm8, %v1055_v39, %v808_v24 }
 0x162   : > { %v1090_v27 = vsel %vm1062_vm8, %v1057_v40, %v810_v25 }
 0x164   : > { %v855_v32 = vpop.permute.xlu0 %854 }
 0x165   : > { %v857_v33 = vpop.permute.xlu1 %856  ;;  %v1121_v10 = vsel %vm1095_vm9, %v1088_v36, %v855_v32 }
 0x166   : > { %v1123_v14 = vsel %vm1095_vm9, %v1090_v27, %v857_v33 }
 0x168   : > { %v890_v0 = vpop.permute.xlu0 %889 }
 0x169   : > { %v575_v49 = vpop.permute.xlu1 %574  ;;  %v1154_v48 = vsel %vm1128_vm10, %v1121_v10, %v890_v0 }
 0x16a   : > { %1760 = vmatprep.mubr.msk.bf16.mxu1 %vm1181_vm11, %v1154_v48  ;;  %v927_v53 = vsel %vm897_vm3, %v2336_v11, %v575_v49 }
 0x16c   : > { %v892_v41 = vpop.permute.xlu0 %891 }
 0x16d   : > { %v577_v42 = vpop.permute.xlu1 %576  ;;  %v1156_v43 = vsel %vm1128_vm10, %v1123_v14, %v892_v41 }
 0x16e   : > { %1761 = vmatmul.mubr.msk.bf16.gmra.mxu1 %vm1181_vm11, %v1156_v43  ;;  %v929_v54 = vsel %vm897_vm3, %v2349_v29, %v577_v42  ;;  %v1738_v13 = vpop.f32.mrf.mxu0 }
 0x16f   : > { %v1450_v31 = vmul.f32 %v1738_v13, %v1738_v13  ;;  %v1382_v34 = vsel %vm930_vm4, %v1738_v13, 0.0 }
 0x170   : > { %v656_v44 = vpop.permute.xlu0 %655  ;;  %v1252_v15 = vpop.f32.mrf.mxu0 }
 0x171   : > { %v658_v45 = vpop.permute.xlu1 %657  ;;  %v960_v55 = vsel %vm930_vm4, %v927_v53, %v656_v44  ;;  %v1448_v21 = vmul.f32 %v1252_v15, %v1252_v15  ;;  %v1379_v24 = vsel %vm930_vm4, %v1252_v15, 0.0  ;;  %v1483_v35 = vsel %vm930_vm4, %v1450_v31, 0.0 }
 0x172   : > { %v962_v56 = vsel %vm930_vm4, %v929_v54, %v658_v45  ;;  %v1739_v12 = vpop.f32.mrf.mxu0 }
 0x173   : > { %v1480_v32 = vsel %vm930_vm4, %v1448_v21, 0.0  ;;  %v1451_v36 = vmul.f32 %v1739_v12, %v1739_v12  ;;  %v1384_v38 = vsel %vm930_vm4, %v1739_v12, 0.0 }
 0x174   : > { %v693_v46 = vpop.permute.xlu0 %692  ;;  %v1255_v16 = vpop.f32.mrf.mxu0 }
 0x175   : > { %v695_v47 = vpop.permute.xlu1 %694  ;;  %v993_v57 = vsel %vm963_vm5, %v960_v55, %v693_v46  ;;  %v1449_v19 = vmul.f32 %v1255_v16, %v1255_v16  ;;  %v1380_v22 = vsel %vm930_vm4, %v1255_v16, 0.0  ;;  %v1485_v27 = vsel %vm930_vm4, %v1451_v36, 0.0 }
 0x176   : > { %v995_v59 = vsel %vm963_vm5, %v962_v56, %v695_v47  ;;  %v1381_v26 = vadd.f32 %v1380_v22, %v1379_v24 }
 0x177   : > { %v1481_v25 = vsel %vm930_vm4, %v1449_v19, 0.0 }
 0x178   : > { %v740_v50 = vpop.permute.xlu0 %739  ;;  %v1482_v1 = vadd.f32 %v1481_v25, %v1480_v32  ;;  %v1383_v39 = vadd.f32 %v1382_v34, %v1381_v26 }
 0x179   : > { %v742_v30 = vpop.permute.xlu1 %741  ;;  %v1026_v61 = vsel %vm996_vm6, %v993_v57, %v740_v50 }
 0x17a   : > { %v1028_v9 = vsel %vm996_vm6, %v995_v59, %v742_v30  ;;  %v1484_v10 = vadd.f32 %v1483_v35, %v1482_v1  ;;  %v1385_v40 = vadd.f32 %v1384_v38, %v1383_v39 }
 0x17c   : > { %v775_v60 = vpop.permute.xlu0 %774  ;;  %v1486_v43 = vadd.f32 %v1485_v27, %v1484_v10 }
 0x17d   : > { %v777_v51 = vpop.permute.xlu1 %776  ;;  %v1059_v63 = vsel %vm1029_vm7, %v1026_v61, %v775_v60 }
 0x17e   : > { %v1061_v11 = vsel %vm1029_vm7, %v1028_v9, %v777_v51 }
 0x180   : > { %v812_v23 = vpop.permute.xlu0 %811 }
 0x181   : > { %v814_v52 = vpop.permute.xlu1 %813  ;;  %v1092_v29 = vsel %vm1062_vm8, %v1059_v63, %v812_v23 }
 0x182   : > { %v1094_v2 = vsel %vm1062_vm8, %v1061_v11, %v814_v52 }
 0x184   : > { %v859_v58 = vpop.permute.xlu0 %858 }
 0x185   : > { %v861_v62 = vpop.permute.xlu1 %860  ;;  %v1125_v4 = vsel %vm1095_vm9, %v1092_v29, %v859_v58 }
 0x186   : > { %v1127_v6 = vsel %vm1095_vm9, %v1094_v2, %v861_v62 }
 0x188   : > { %v894_v5 = vpop.permute.xlu0 %893 }
 0x189   : > { %v896_v28 = vpop.permute.xlu1 %895  ;;  %v1158_v7 = vsel %vm1128_vm10, %v1125_v4, %v894_v5 }
 0x18a   : > { %v1160_v8 = vsel %vm1128_vm10, %v1127_v6, %v896_v28  ;;  %1764 = vmatprep.mubr.msk.bf16.mxu1 %vm1181_vm11, %v1158_v7 }
 0x18b   : > { %1765 = vmatmul.mubr.msk.bf16.gmra.mxu1 %vm1181_vm11, %v1160_v8 }
 0x18e   : > { %v1742_v17 = vpop.f32.mrf.mxu0 }
 0x18f   : > { %v1454_v50 = vmul.f32 %v1742_v17, %v1742_v17  ;;  %v1390_v51 = vsel %vm930_vm4, %v1742_v17, 0.0 }
 0x190   : > { %v1268_v18 = vpop.f32.mrf.mxu0 }
 0x191   : > { %v1452_v37 = vmul.f32 %v1268_v18, %v1268_v18  ;;  %v1386_v49 = vsel %vm930_vm4, %v1268_v18, 0.0  ;;  %v1491_v53 = vsel %vm930_vm4, %v1454_v50, 0.0 }
 0x192   : > { %v1743_v20 = vpop.f32.mrf.mxu0  ;;  %v1387_v42 = vadd.f32 %v1386_v49, %v1385_v40 }
 0x193   : > { %v1487_v14 = vsel %vm930_vm4, %v1452_v37, 0.0  ;;  %v1455_v54 = vmul.f32 %v1743_v20, %v1743_v20  ;;  %v1392_v57 = vsel %vm930_vm4, %v1743_v20, 0.0 }
 0x194   : > { %v1271_v3 = vpop.f32.mrf.mxu0  ;;  %v1488_v46 = vadd.f32 %v1487_v14, %v1486_v43 }
 0x195   : > { %v1453_v48 = vmul.f32 %v1271_v3, %v1271_v3  ;;  %v1388_v41 = vsel %vm930_vm4, %v1271_v3, 0.0  ;;  %v1493_v9 = vsel %vm930_vm4, %v1455_v54, 0.0 }
 0x196   : > { %v1389_v47 = vadd.f32 %v1388_v41, %v1387_v42 }
 0x197   : > { %v1489_v45 = vsel %vm930_vm4, %v1453_v48, 0.0 }
 0x198   : > { %v1490_v30 = vadd.f32 %v1489_v45, %v1488_v46  ;;  %v1391_v23 = vadd.f32 %v1390_v51, %v1389_v47 }
 0x19a   : > { %v1492_v56 = vadd.f32 %v1491_v53, %v1490_v30  ;;  %v1393_v61 = vadd.f32 %v1392_v57, %v1391_v23 }
 0x19c   : > { %v1494_v2 = vadd.f32 %v1493_v9, %v1492_v56 }
 0x1ae   : > { %v1746_v33 = vpop.f32.mrf.mxu0 }
 0x1af   : > { %v1458_v8 = vmul.f32 %v1746_v33, %v1746_v33  ;;  %v1398_v15 = vsel %vm930_vm4, %v1746_v33, 0.0 }
 0x1b0   : > { %v1284_v0 = vpop.f32.mrf.mxu0 }
 0x1b1   : > { %v1456_v55 = vmul.f32 %v1284_v0, %v1284_v0  ;;  %v1394_v58 = vsel %vm930_vm4, %v1284_v0, 0.0  ;;  %v1499_v18 = vsel %vm930_vm4, %v1458_v8, 0.0 }
 0x1b2   : > { %v1747_v44 = vpop.f32.mrf.mxu0  ;;  %v1395_v29 = vadd.f32 %v1394_v58, %v1393_v61 }
 0x1b3   : > { %v1495_v63 = vsel %vm930_vm4, %v1456_v55, 0.0  ;;  %v1459_v19 = vmul.f32 %v1747_v44, %v1747_v44  ;;  %v1400_v22 = vsel %vm930_vm4, %v1747_v44, 0.0 }
 0x1b4   : > { %v1287_v60 = vpop.f32.mrf.mxu0  ;;  %v1496_v5 = vadd.f32 %v1495_v63, %v1494_v2 }
 0x1b5   : > { %v1457_v59 = vmul.f32 %v1287_v60, %v1287_v60  ;;  %v1396_v11 = vsel %vm930_vm4, %v1287_v60, 0.0  ;;  %v1501_v31 = vsel %vm930_vm4, %v1459_v19, 0.0 }
 0x1b6   : > { %v1397_v6 = vadd.f32 %v1396_v11, %v1395_v29 }
 0x1b7   : > { %v1497_v4 = vsel %vm930_vm4, %v1457_v59, 0.0 }
 0x1b8   : > { %v1498_v13 = vadd.f32 %v1497_v4, %v1496_v5  ;;  %v1399_v12 = vadd.f32 %v1398_v15, %v1397_v6 }
 0x1ba   : > { %v1500_v21 = vadd.f32 %v1499_v18, %v1498_v13  ;;  %v1401_v26 = vadd.f32 %v1400_v22, %v1399_v12 }
 0x1bc   : > { %v1502_v34 = vadd.f32 %v1501_v31, %v1500_v21 }
 0x1ce   : > { %v1750_v52 = vpop.f32.mrf.mxu0 }
 0x1cf   : > { %v1462_v10 = vmul.f32 %v1750_v52, %v1750_v52  ;;  %v1406_v49 = vsel %vm930_vm4, %v1750_v52, 0.0 }
 0x1d0   : > { %v1300_v62 = vpop.f32.mrf.mxu0 }
 0x1d1   : > { %v1460_v20 = vmul.f32 %v1300_v62, %v1300_v62  ;;  %v1402_v24 = vsel %vm930_vm4, %v1300_v62, 0.0  ;;  %v1507_v40 = vsel %vm930_vm4, %v1462_v10, 0.0 }
 0x1d2   : > { %v1751_v28 = vpop.f32.mrf.mxu0  ;;  %v1403_v33 = vadd.f32 %v1402_v24, %v1401_v26 }
 0x1d3   : > { %v1503_v32 = vsel %vm930_vm4, %v1460_v20, 0.0  ;;  %v1463_v27 = vmul.f32 %v1751_v28, %v1751_v28  ;;  %v1408_v43 = vsel %vm930_vm4, %v1751_v28, 0.0 }
 0x1d4   : > { %v1303_v16 = vpop.f32.mrf.mxu0  ;;  %v1504_v35 = vadd.f32 %v1503_v32, %v1502_v34 }
 0x1d5   : > { %v1461_v25 = vmul.f32 %v1303_v16, %v1303_v16  ;;  %v1404_v1 = vsel %vm930_vm4, %v1303_v16, 0.0  ;;  %v1509_v47 = vsel %vm930_vm4, %v1463_v27, 0.0 }
 0x1d6   : > { %v1405_v36 = vadd.f32 %v1404_v1, %v1403_v33 }
 0x1d7   : > { %v1505_v39 = vsel %vm930_vm4, %v1461_v25, 0.0 }
 0x1d8   : > { %v1506_v0 = vadd.f32 %v1505_v39, %v1504_v35  ;;  %v1407_v48 = vadd.f32 %v1406_v49, %v1405_v36 }
 0x1da   : > { %v1508_v41 = vadd.f32 %v1507_v40, %v1506_v0  ;;  %v1409_v46 = vadd.f32 %v1408_v43, %v1407_v48 }
 0x1dc   : > { %v1510_v51 = vadd.f32 %v1509_v47, %v1508_v41 }
 0x1ee   : > { %v1754_v7 = vpop.f32.mrf.mxu1 }
 0x1ef   : > { %v1466_v55 = vmul.f32 %v1754_v7, %v1754_v7  ;;  %v1414_v58 = vsel %vm930_vm4, %v1754_v7, 0.0 }
 0x1f0   : > { %v1316_v17 = vpop.f32.mrf.mxu1 }
 0x1f1   : > { %v1464_v14 = vmul.f32 %v1316_v17, %v1316_v17  ;;  %v1410_v44 = vsel %vm930_vm4, %v1316_v17, 0.0  ;;  %v1515_v62 = vsel %vm930_vm4, %v1466_v55, 0.0 }
 0x1f2   : > { %v1755_v3 = vpop.f32.mrf.mxu1  ;;  %v1411_v60 = vadd.f32 %v1410_v44, %v1409_v46 }
 0x1f3   : > { %v1511_v50 = vsel %vm930_vm4, %v1464_v14, 0.0  ;;  %v1467_v9 = vmul.f32 %v1755_v3, %v1755_v3  ;;  %v1416_v29 = vsel %vm930_vm4, %v1755_v3, 0.0 }
 0x1f4   : > { %v1319_v37 = vpop.f32.mrf.mxu1  ;;  %v1512_v53 = vadd.f32 %v1511_v50, %v1510_v51 }
 0x1f5   : > { %v1465_v45 = vmul.f32 %v1319_v37, %v1319_v37  ;;  %v1412_v30 = vsel %vm930_vm4, %v1319_v37, 0.0  ;;  %v1517_v28 = vsel %vm930_vm4, %v1467_v9, 0.0 }
 0x1f6   : > { %v1413_v54 = vadd.f32 %v1412_v30, %v1411_v60 }
 0x1f7   : > { %v1513_v52 = vsel %vm930_vm4, %v1465_v45, 0.0 }
 0x1f8   : > { %v1514_v56 = vadd.f32 %v1513_v52, %v1512_v53  ;;  %v1415_v59 = vadd.f32 %v1414_v58, %v1413_v54 }
 0x1fa   : > { %v1516_v11 = vadd.f32 %v1515_v62, %v1514_v56  ;;  %v1417_v5 = vadd.f32 %v1416_v29, %v1415_v59 }
 0x1fc   : > { %v1518_v15 = vadd.f32 %v1517_v28, %v1516_v11 }
 0x20e   : > { %v1758_v38 = vpop.f32.mrf.mxu1 }
 0x20f   : > { %v1470_v19 = vmul.f32 %v1758_v38, %v1758_v38  ;;  %v1422_v21 = vsel %vm930_vm4, %v1758_v38, 0.0 }
 0x210   : > { %v1332_v42 = vpop.f32.mrf.mxu1 }
 0x211   : > { %v1468_v63 = vmul.f32 %v1332_v42, %v1332_v42  ;;  %v1418_v2 = vsel %vm930_vm4, %v1332_v42, 0.0  ;;  %v1523_v25 = vsel %vm930_vm4, %v1470_v19, 0.0 }
 0x212   : > { %v1759_v23 = vpop.f32.mrf.mxu1  ;;  %v1419_v13 = vadd.f32 %v1418_v2, %v1417_v5 }
 0x213   : > { %v1519_v8 = vsel %vm930_vm4, %v1468_v63, 0.0  ;;  %v1471_v26 = vmul.f32 %v1759_v23, %v1759_v23  ;;  %v1424_v32 = vsel %vm930_vm4, %v1759_v23, 0.0 }
 0x214   : > { %v1335_v57 = vpop.f32.mrf.mxu1  ;;  %v1520_v16 = vadd.f32 %v1519_v8, %v1518_v15 }
 0x215   : > { %v1469_v4 = vmul.f32 %v1335_v57, %v1335_v57  ;;  %v1420_v7 = vsel %vm930_vm4, %v1335_v57, 0.0  ;;  %v1525_v39 = vsel %vm930_vm4, %v1471_v26, 0.0 }
 0x216   : > { %v1421_v17 = vadd.f32 %v1420_v7, %v1419_v13 }
 0x217   : > { %v1521_v12 = vsel %vm930_vm4, %v1469_v4, 0.0 }
 0x218   : > { %v1522_v20 = vadd.f32 %v1521_v12, %v1520_v16  ;;  %v1423_v22 = vadd.f32 %v1422_v21, %v1421_v17 }
 0x21a   : > { %v1524_v31 = vadd.f32 %v1523_v25, %v1522_v20  ;;  %v1425_v34 = vadd.f32 %v1424_v32, %v1423_v22 }
 0x21c   : > { %v1526_v10 = vadd.f32 %v1525_v39, %v1524_v31 }
 0x22e   : > { %v1762_v61 = vpop.f32.mrf.mxu1 }
 0x22f   : > { %v1474_v48 = vmul.f32 %v1762_v61, %v1762_v61  ;;  %v1430_v27 = vsel %vm930_vm4, %v1762_v61, 0.0 }
 0x230   : > { %v1348_v6 = vpop.f32.mrf.mxu1 }
 0x231   : > { %v1472_v3 = vmul.f32 %v1348_v6, %v1348_v6  ;;  %v1426_v1 = vsel %vm930_vm4, %v1348_v6, 0.0  ;;  %v1531_v42 = vsel %vm930_vm4, %v1474_v48, 0.0 }
 0x232   : > { %v1763_v18 = vpop.f32.mrf.mxu1  ;;  %v1427_v37 = vadd.f32 %v1426_v1, %v1425_v34 }
 0x233   : > { %v1527_v35 = vsel %vm930_vm4, %v1472_v3, 0.0  ;;  %v1475_v43 = vmul.f32 %v1763_v18, %v1763_v18  ;;  %v1432_v46 = vsel %vm930_vm4, %v1763_v18, 0.0 }
 0x234   : > { %v1351_v24 = vpop.f32.mrf.mxu1  ;;  %v1528_v38 = vadd.f32 %v1527_v35, %v1526_v10 }
 0x235   : > { %v1473_v33 = vmul.f32 %v1351_v24, %v1351_v24  ;;  %v1428_v36 = vsel %vm930_vm4, %v1351_v24, 0.0  ;;  %v1533_v51 = vsel %vm930_vm4, %v1475_v43, 0.0 }
 0x236   : > { %v1429_v49 = vadd.f32 %v1428_v36, %v1427_v37 }
 0x237   : > { %v1529_v0 = vsel %vm930_vm4, %v1473_v33, 0.0 }
 0x238   : > { %v1530_v40 = vadd.f32 %v1529_v0, %v1528_v38  ;;  %v1431_v14 = vadd.f32 %v1430_v27, %v1429_v49 }
 0x23a   : > { %v1532_v44 = vadd.f32 %v1531_v42, %v1530_v40  ;;  %v1433_v30 = vadd.f32 %v1432_v46, %v1431_v14 }
 0x23c   : > { %v1534_v53 = vadd.f32 %v1533_v51, %v1532_v44 }
 0x24b   : > { %v1766_v41 = vpop.f32.mrf.mxu1 }
 0x24c   : > { %v1478_v55 = vmul.f32 %v1766_v41, %v1766_v41  ;;  %v1438_v61 = vsel %vm930_vm4, %v1766_v41, 0.0 }
 0x24d   : > { %v1364_v45 = vpop.f32.mrf.mxu1 }
 0x24e   : > { %v1434_v47 = vsel %vm930_vm4, %v1364_v45, 0.0  ;;  %v1476_v50 = vmul.f32 %v1364_v45, %v1364_v45  ;;  %v1539_v29 = vsel %vm930_vm4, %v1478_v55, 0.0 }
 0x24f   : > { %v1767_v60 = vpop.f32.mrf.mxu1  ;;  %v1435_v52 = vadd.f32 %v1434_v47, %v1433_v30 }
 0x250   : > { %v1535_v23 = vsel %vm930_vm4, %v1476_v50, 0.0  ;;  %v1479_v62 = vmul.f32 %v1767_v60, %v1767_v60  ;;  %v1440_v2 = vsel %vm930_vm4, %v1767_v60, 0.0 }
 0x251   : > { %v1367_v54 = vpop.f32.mrf.mxu1  ;;  %v1536_v58 = vadd.f32 %v1535_v23, %v1534_v53 }
 0x252   : > { %v1436_v56 = vsel %vm930_vm4, %v1367_v54, 0.0  ;;  %v1477_v57 = vmul.f32 %v1367_v54, %v1367_v54  ;;  %v1541_v6 = vsel %vm930_vm4, %v1479_v62, 0.0 }
 0x253   : > { %v1437_v59 = vadd.f32 %v1436_v56, %v1435_v52 }
 0x254   : > { %v1537_v9 = vsel %vm930_vm4, %v1477_v57, 0.0 }
 0x255   : > { %v1439_v63 = vadd.f32 %v1438_v61, %v1437_v59  ;;  %v1538_v11 = vadd.f32 %v1537_v9, %v1536_v58 }
 0x257   : > { %v1441_v4 = vadd.f32 %v1440_v2, %v1439_v63  ;;  %v1540_v5 = vadd.f32 %v1539_v29, %v1538_v11 }
 0x259   : > { %v1442_v28 = vrot.slane %v1441_v4, 4  ;;  %v1542_v8 = vadd.f32 %v1541_v6, %v1540_v5 }
 0x25b   : > { %v1443_v7 = vadd.f32 %v1442_v28, %v1441_v4  ;;  %v1543_v13 = vrot.slane %v1542_v8, 4 }
 0x25d   : > { %v1444_v15 = vrot.slane %v1443_v7, 2  ;;  %v1544_v12 = vadd.f32 %v1543_v13, %v1542_v8 }
 0x25f   : > { %v1445_v16 = vadd.f32 %v1444_v15, %v1443_v7  ;;  %v1545_v17 = vrot.slane %v1544_v12, 2 }
 0x261   : > { %v1446_v18 = vrot.slane %v1445_v16, 1  ;;  %v1546_v19 = vadd.f32 %v1545_v17, %v1544_v12 }
 0x263   : > { %v1547_v20 = vrot.slane %v1546_v19, 1  ;;  %v1447_v21 = vadd.f32 %v1446_v18, %v1445_v16 }
 0x265   : > { %v1548_v22 = vadd.f32 %v1547_v20, %v1546_v19 }
 0x267   : > { %v1550_v24 = vsel %vm1549_vm12, %v1447_v21, %v1548_v22 }
 0x268   : > { %1552 = vst.msk [vmem:[%s160_s27] sm:$0x3] %vm1551_vm13, %v1550_v24 }
 0x269   : > { %1892 = shalt.err (!%p1889_p5)
}
 0x26a   : > { %s1893_s8 = scalar_lea.hbm %s2597_s3, 32  ;;  %s1897_s18 = scalar_lea.hbm %s2639_s2, 64 }
 0x26b   : > { %p1894_p6 = scmp.ne.s32.totalorder %s2597_s3, %s1893_s8  ;;  %p1898_p10 = scmp.lt.s32.totalorder %s2597_s3, %s2639_s2 }
 0x26c   : > { %p1899_p11 = scmp.lt.s32.totalorder %s1897_s18, %s1893_s8 }
 0x26d   : > { %p1895_p7 = pnand %p1894_p6, %p2021_p4 }
 0x26e   : > { %p1900_p12 = por %p1899_p11, %p1898_p10 }
 0x26f   : > { %p1896_p9 = pneg %p1895_p7 }
 0x271   : > { %p1901_p13 = pnand %p1900_p12, %p1896_p9 }
 0x273   : > { %1904 = shalt.err (!%p1901_p13)
}
 0x274   : > { %1777 = dma.vmem_to_hbm [thread:$0]  (%p2021_p4), %s1569_s28, 32, %s2597_s3, %s1554_s4  }
 0x275 PF: > { %p1783_p0 = scmp.ge.s32.totalorder %s1955_s14, 2  ;;  %s1580_s24 = sand.u32 1, %s1935_s9  }
 0x276   : > { %s1581_s25 = scalar_lea.sflag [#allocation3], %s1580_s24 }
 0x277   : > { %p1780_p1 = pnand %p1783_p0, %p2028_p8 }
 0x279   : > { %p1781_p2 = pneg %p1780_p1 }
 0x27b   : > { %1930 = dma.done.wait (%p1781_p2), %s1581_s25, 32  }
 0x27c   : > { %1932 = vsyncadd (%p1781_p2), %s1581_s25, 4294967264  ;;  %s15_s14 = sadd.s32 1, %s1955_s14   ;;  %s2642_s9 = smov %s1939_s10 }
 0x27d   : > { %p12_p3 = scmp.ge.s32.totalorder %s15_s14, 4   ;;  %s2643_s10 = smov %s1943_s11 }
 0x27e   : > { %s2644_s11 = smov %s2034_s22  ;;  %s2645_s12 = smov %s1951_s13 }
 0x27f   : > { %s2646_s13 = smov %s2648_s17  ;;  %14 = sbr.rel (!%p12_p3) target bundleno = 4 (0x4), region = 63 }
 0x284   :  { %1586 = vsyncpa [#allocation3], 1 }
 0x285   :  { %1588 = vsyncpa [#allocation3 + $0x1], 1 }

</bundles_post_ra>
